<compile_context>
chip_gen: v6e
topology: v6e:2x2x1
jax: 0.10.0
libtpu: 0.0.40
codegen_flags: <defaults>
</compile_context>

<pallas_src>
import math

import jax
import jax.numpy as jnp
import numpy as np
from jax.experimental import pallas as pl
from jax.experimental.pallas import tpu as pltpu

LN_EPS = 1e-6


def encoder_layer_forward(x, tp, *, num_heads):
    """x: (B, S, D) float32, tp: torch-layout params. Returns (B, S, D)."""
    B, S, D = x.shape
    KW = tp["conv_w"].shape[-1]
    H = num_heads
    DK = D // H
    F = tp["w1"].shape[0]
    assert H * DK == D

    bf16 = jnp.bfloat16

    # ---------------- host-side parameter repacking ----------------
    # im2col conv weight: lane block d multiplies the input delayed by d (tap k = KW-1-d).
    wc = jnp.concatenate([tp["conv_w"][:, :, KW - 1 - d] for d in range(KW)],
                         axis=1).astype(bf16)                       # (S, KW*S)
    bc = tp["conv_b"].reshape(S, 1).astype(jnp.float32)             # (S, 1) broadcast over lanes
    # attention weight slab [Wq | Wk | Wv | Wo], all pre-transposed to (in, out)
    wa = jnp.concatenate([tp["wq"].T, tp["wk"].T, tp["wv"].T, tp["wo"].T],
                         axis=1).astype(bf16)                       # (D, 4D)
    # packed D-wide vectors: bq, bk, bv, bo, ln_a, ln_b, b2
    vecs = jnp.stack([tp["bq"], tp["bk"], tp["bv"], tp["bo"],
                      tp["ln_a"], tp["ln_b"], tp["b2"]]).astype(jnp.float32)   # (7, D)
    w1 = tp["w1"].T.astype(bf16)                                    # (D, F)
    b1 = tp["b1"].reshape(1, F).astype(jnp.float32)                 # (1, F)
    w2 = tp["w2"].T.astype(bf16)                                    # (F, D)

    scale = 1.0 / math.sqrt(DK)

    # Grid: 2 "parallel" batch-chunk steps (both v7x TCs busy; near-optimal on 1-TC chips),
    # falling back to a single step if B is odd / 1.
    nsteps = 2 if (B % 2 == 0 and B >= 2) else 1
    Bb = B // nsteps
    R = Bb * S                       # flattened row count for all dense layers

    def kernel(x_ref, wc_ref, bc_ref, wa_ref, vec_ref, w1_ref, b1_ref, w2_ref, out_ref):
        xf = x_ref[...].reshape(R, D)                    # (R, D) f32
        xb = xf.astype(bf16)                             # delayed-by-0 copy, also feeds K/V

        # ---- CausalConv1d(kernel=KW): lane-roll delays (XLU/VPU) + one K=KW*S matmul ----
        lane = jax.lax.broadcasted_iota(jnp.int32, (R, D), 1)
        delayed = [xb]
        for d in range(1, KW):
            xr = pltpu.roll(xf, shift=d, axis=1)         # lane j <- lane j-d (wraps)
            delayed.append(jnp.where(lane >= d, xr, 0.0).astype(bf16))   # zero-fill first d lanes

        conv_blocks = []
        for b in range(Bb):                              # channel mix is per-sample
            xcat = jnp.concatenate([xd[b * S:(b + 1) * S, :] for xd in delayed],
                                   axis=0)               # (KW*S, D) bf16
            cb = jnp.dot(wc_ref[...], xcat, preferred_element_type=jnp.float32)   # (S, D)
            conv_blocks.append(cb + bc_ref[...])
        conv = jnp.concatenate(conv_blocks, axis=0) if Bb > 1 else conv_blocks[0]  # (R, D) f32

        # ---- projections: Q from conv output, fused K|V (N=2D) from x_in ----
        q = jnp.dot(conv.astype(bf16), wa_ref[:, 0:D],
                    preferred_element_type=jnp.float32) + vec_ref[0:1, :]
        kv = jnp.dot(xb, wa_ref[:, D:3 * D], preferred_element_type=jnp.float32)
        kk = kv[:, 0:D] + vec_ref[1:2, :]
        vv = kv[:, D:2 * D] + vec_ref[2:3, :]

        q_bf = q.astype(bf16)
        k_bf = kk.astype(bf16)
        v_bf = vv.astype(bf16)

        # ---- multi-head attention (per sample, per head); output projection folded in ----
        attn_blocks = []
        for b in range(Bb):
            r0 = b * S
            acc = jnp.zeros((S, D), jnp.float32)
            for h in range(H):
                lo = h * DK
                qh = q_bf[r0:r0 + S, lo:lo + DK]
                kh = k_bf[r0:r0 + S, lo:lo + DK]
                vh = v_bf[r0:r0 + S, lo:lo + DK]
                s = jax.lax.dot_general(qh, kh, (((1,), (1,)), ((), ())),
                                        preferred_element_type=jnp.float32) * scale
                s = s - jnp.max(s, axis=-1, keepdims=True)
                p = jnp.exp(s)
                p = p * pl.reciprocal(jnp.sum(p, axis=-1, keepdims=True), approx=True)
                oh = jnp.dot(p.astype(bf16), vh, preferred_element_type=jnp.float32)      # (S, DK)
                acc = acc + jnp.dot(oh.astype(bf16), wa_ref[lo:lo + DK, 3 * D:4 * D],
                                    preferred_element_type=jnp.float32)
            attn_blocks.append(acc)
        attn = (jnp.concatenate(attn_blocks, axis=0) if Bb > 1 else attn_blocks[0]) \
            + vec_ref[3:4, :]

        # ---- sublayer 0 residual (its LayerNorm output is discarded by the lambda) ----
        x1 = conv + attn

        # ---- sublayer 1: LayerNorm (torch: unbiased std, /(std+eps)) -> FFN -> residual ----
        mu = jnp.mean(x1, axis=-1, keepdims=True)
        xc = x1 - mu
        var_u = jnp.mean(xc * xc, axis=-1, keepdims=True) * (float(D) / float(D - 1))
        std = jnp.sqrt(var_u)
        ln = vec_ref[4:5, :] * xc * pl.reciprocal(std + LN_EPS, approx=True) + vec_ref[5:6, :]

        hid = jnp.maximum(
            jnp.dot(ln.astype(bf16), w1_ref[...], preferred_element_type=jnp.float32)
            + b1_ref[...], 0.0)
        ff = jnp.dot(hid.astype(bf16), w2_ref[...], preferred_element_type=jnp.float32) \
            + vec_ref[6:7, :]

        out_ref[...] = (x1 + ff).reshape(Bb, S, D).astype(out_ref.dtype)

    weights = (wc, bc, wa, vecs, w1, b1, w2)
    in_specs = [pl.BlockSpec((Bb, S, D), lambda i: (i, 0, 0))]
    in_specs += [pl.BlockSpec(tuple(w.shape), lambda i: (0, 0)) for w in weights]

    flops_per_sample = (
        2 * S * (KW * S) * D          # im2col causal conv
        + 2 * S * D * D               # Q projection
        + 2 * S * D * (2 * D)         # fused K|V projection
        + 2 * 2 * S * S * D           # scores + probs @ V (all heads)
        + 2 * S * D * D               # (folded) output projection
        + 2 * 2 * S * D * F           # FFN
    )
    cost = pl.CostEstimate(
        flops=B * flops_per_sample,
        transcendentals=B * (H * S * S + S * (H + 2)),   # softmax exp + sqrt + reciprocals
        bytes_accessed=(4 * 2 * B * S * D
                        + 2 * (int(wc.size) + int(wa.size) + int(w1.size) + int(w2.size))
                        + 4 * (int(bc.size) + int(vecs.size) + int(b1.size))),
    )

    return pl.pallas_call(
        kernel,
        out_shape=jax.ShapeDtypeStruct((B, S, D), x.dtype),
        grid=(nsteps,),
        in_specs=in_specs,
        out_specs=pl.BlockSpec((Bb, S, D), lambda i: (i, 0, 0)),
        compiler_params=pltpu.CompilerParams(dimension_semantics=("parallel",)),
        cost_estimate=cost,
    )(x, *weights)


def reference(x, tp, num_heads):
    """Pure-JAX reference mirroring the PyTorch forward (torch-layout params, f32 HIGHEST)."""
    B, S, D = x.shape
    H = num_heads
    DK = D // H
    KW = tp["conv_w"].shape[-1]
    HI = jax.lax.Precision.HIGHEST

    # CausalConv1d
    xp = jnp.pad(x, ((0, 0), (0, 0), (KW - 1, 0)))
    conv = jnp.zeros_like(x)
    for k in range(KW):
        conv = conv + jnp.einsum("oc,bct->bot", tp["conv_w"][:, :, k], xp[:, :, k:k + D],
                                 precision=HI)
    conv = conv + tp["conv_b"][None, :, None]

    def linear(h, w, b):        # torch Linear: y = h @ W.T + b
        return jnp.einsum("...i,oi->...o", h, w, precision=HI) + b

    q = linear(conv, tp["wq"], tp["bq"])
    k_ = linear(x, tp["wk"], tp["bk"])
    v = linear(x, tp["wv"], tp["bv"])

    def split(t):
        return t.reshape(B, S, H, DK).transpose(0, 2, 1, 3)

    qh, kh, vh = split(q), split(k_), split(v)
    sc = jnp.einsum("bhqd,bhkd->bhqk", qh, kh, precision=HI) / math.sqrt(DK)
    pr = jax.nn.softmax(sc, axis=-1)
    oh = jnp.einsum("bhqk,bhkd->bhqd", pr, vh, precision=HI)
    o = oh.transpose(0, 2, 1, 3).reshape(B, S, D)
    attn = linear(o, tp["wo"], tp["bo"])

    x1 = conv + attn            # sublayer 0 (LayerNorm output unused by the lambda)

    mu = jnp.mean(x1, axis=-1, keepdims=True)
    std = jnp.std(x1, axis=-1, keepdims=True, ddof=1)
    ln = tp["ln_a"] * (x1 - mu) / (std + LN_EPS) + tp["ln_b"]
    ff = linear(jax.nn.relu(linear(ln, tp["w1"], tp["b1"])), tp["w2"], tp["b2"])
    return x1 + ff


if __name__ == "__main__":
    B, S, D, H, F = 4, 16, 128, 4, 256     # batch, afr_reduced_cnn_size, size(d_model), heads, d_ff
    KW = 7
    key = jax.random.PRNGKey(0)
    ks = jax.random.split(key, 14)

    x = jax.random.normal(ks[0], (B, S, D), dtype=jnp.float32)

    def rnd(k, shape, scale):
        return scale * jax.random.normal(k, shape, dtype=jnp.float32)

    tp = dict(
        conv_w=rnd(ks[1], (S, S, KW), 0.15),
        conv_b=rnd(ks[2], (S,), 0.1),
        wq=rnd(ks[3], (D, D), D ** -0.5), bq=rnd(ks[4], (D,), 0.02),
        wk=rnd(ks[5], (D, D), D ** -0.5), bk=rnd(ks[6], (D,), 0.02),
        wv=rnd(ks[7], (D, D), D ** -0.5), bv=rnd(ks[8], (D,), 0.02),
        wo=rnd(ks[9], (D, D), D ** -0.5), bo=rnd(ks[10], (D,), 0.02),
        ln_a=jnp.ones((D,), jnp.float32),
        ln_b=jnp.zeros((D,), jnp.float32),
        w1=rnd(ks[11], (F, D), D ** -0.5), b1=rnd(ks[12], (F,), 0.02),
        w2=rnd(ks[13], (D, F), F ** -0.5), b2=jnp.zeros((D,), jnp.float32),
    )

    out = jax.block_until_ready(encoder_layer_forward(x, tp, num_heads=H))
    ref = reference(x, tp, H)
    # Tolerance reflects bf16 MXU operands (f32 accumulation) and EUP approx reciprocals.
    np.testing.assert_allclose(np.asarray(out), np.asarray(ref), rtol=5e-2, atol=5e-2)
    print("KERNEL_OK")
</pallas_src>

<mosaic_0001>
module attributes {stable_mosaic.version = 11 : i64} {
  func.func @kernel(%arg0: i32, %arg1: memref<2x16x128xf32, #tpu.memory_space<vmem>>, %arg2: memref<16x112xbf16, #tpu.memory_space<vmem>>, %arg3: memref<16x1xf32, #tpu.memory_space<vmem>>, %arg4: memref<128x512xbf16, #tpu.memory_space<vmem>>, %arg5: memref<7x128xf32, #tpu.memory_space<vmem>>, %arg6: memref<128x256xbf16, #tpu.memory_space<vmem>>, %arg7: memref<1x256xf32, #tpu.memory_space<vmem>>, %arg8: memref<256x128xbf16, #tpu.memory_space<vmem>>, %arg9: memref<2x16x128xf32, #tpu.memory_space<vmem>>) attributes {dimension_semantics = [#tpu.dimension_semantics<parallel>], iteration_bounds = array<i64: 2>, scalar_prefetch = 0 : i64, scratch_operands = 0 : i64, tpu.core_type = #tpu.core_type<tc>, window_params = [{transform_indices = @transform_0, window_bounds = array<i64: 2, 16, 128>}, {pipeline_mode = #tpu.pipeline_mode<synchronous>, transform_indices = @transform_1, window_bounds = array<i64: 16, 112>}, {pipeline_mode = #tpu.pipeline_mode<synchronous>, transform_indices = @transform_2, window_bounds = array<i64: 16, 1>}, {pipeline_mode = #tpu.pipeline_mode<synchronous>, transform_indices = @transform_3, window_bounds = array<i64: 128, 512>}, {pipeline_mode = #tpu.pipeline_mode<synchronous>, transform_indices = @transform_4, window_bounds = array<i64: 7, 128>}, {pipeline_mode = #tpu.pipeline_mode<synchronous>, transform_indices = @transform_5, window_bounds = array<i64: 128, 256>}, {pipeline_mode = #tpu.pipeline_mode<synchronous>, transform_indices = @transform_6, window_bounds = array<i64: 1, 256>}, {pipeline_mode = #tpu.pipeline_mode<synchronous>, transform_indices = @transform_7, window_bounds = array<i64: 256, 128>}, {transform_indices = @transform_8, window_bounds = array<i64: 2, 16, 128>}]} {
    %c0 = arith.constant 0 : index
    %c0_0 = arith.constant 0 : index
    %c0_1 = arith.constant 0 : index
    %0 = vector.load %arg1[%c0, %c0_0, %c0_1] : memref<2x16x128xf32, #tpu.memory_space<vmem>>, vector<2x16x128xf32>
    %1 = vector.shape_cast %0 : vector<2x16x128xf32> to vector<32x128xf32>
    %2 = arith.truncf %1 : vector<32x128xf32> to vector<32x128xbf16>
    %3 = tpu.iota {dimensions = array<i32: 1>} : vector<32x128xi32>
    %c1_i32 = arith.constant 1 : i32
    %4 = tpu.dynamic_rotate %1 by %c1_i32 dim 1 : vector<32x128xf32>, i32 -> vector<32x128xf32>
    %c1_i32_2 = arith.constant 1 : i32
    %5 = vector.broadcast %c1_i32_2 : i32 to vector<32x128xi32>
    %6 = arith.cmpi sge, %3, %5 : vector<32x128xi32>
    %cst = arith.constant 0.000000e+00 : f32
    %7 = vector.broadcast %cst : f32 to vector<32x128xf32>
    %8 = arith.select %6, %4, %7 : vector<32x128xi1>, vector<32x128xf32>
    %9 = arith.truncf %8 : vector<32x128xf32> to vector<32x128xbf16>
    %c2_i32 = arith.constant 2 : i32
    %10 = tpu.dynamic_rotate %1 by %c2_i32 dim 1 : vector<32x128xf32>, i32 -> vector<32x128xf32>
    %c2_i32_3 = arith.constant 2 : i32
    %11 = vector.broadcast %c2_i32_3 : i32 to vector<32x128xi32>
    %12 = arith.cmpi sge, %3, %11 : vector<32x128xi32>
    %cst_4 = arith.constant 0.000000e+00 : f32
    %13 = vector.broadcast %cst_4 : f32 to vector<32x128xf32>
    %14 = arith.select %12, %10, %13 : vector<32x128xi1>, vector<32x128xf32>
    %15 = arith.truncf %14 : vector<32x128xf32> to vector<32x128xbf16>
    %c3_i32 = arith.constant 3 : i32
    %16 = tpu.dynamic_rotate %1 by %c3_i32 dim 1 : vector<32x128xf32>, i32 -> vector<32x128xf32>
    %c3_i32_5 = arith.constant 3 : i32
    %17 = vector.broadcast %c3_i32_5 : i32 to vector<32x128xi32>
    %18 = arith.cmpi sge, %3, %17 : vector<32x128xi32>
    %cst_6 = arith.constant 0.000000e+00 : f32
    %19 = vector.broadcast %cst_6 : f32 to vector<32x128xf32>
    %20 = arith.select %18, %16, %19 : vector<32x128xi1>, vector<32x128xf32>
    %21 = arith.truncf %20 : vector<32x128xf32> to vector<32x128xbf16>
    %c4_i32 = arith.constant 4 : i32
    %22 = tpu.dynamic_rotate %1 by %c4_i32 dim 1 : vector<32x128xf32>, i32 -> vector<32x128xf32>
    %c4_i32_7 = arith.constant 4 : i32
    %23 = vector.broadcast %c4_i32_7 : i32 to vector<32x128xi32>
    %24 = arith.cmpi sge, %3, %23 : vector<32x128xi32>
    %cst_8 = arith.constant 0.000000e+00 : f32
    %25 = vector.broadcast %cst_8 : f32 to vector<32x128xf32>
    %26 = arith.select %24, %22, %25 : vector<32x128xi1>, vector<32x128xf32>
    %27 = arith.truncf %26 : vector<32x128xf32> to vector<32x128xbf16>
    %c5_i32 = arith.constant 5 : i32
    %28 = tpu.dynamic_rotate %1 by %c5_i32 dim 1 : vector<32x128xf32>, i32 -> vector<32x128xf32>
    %c5_i32_9 = arith.constant 5 : i32
    %29 = vector.broadcast %c5_i32_9 : i32 to vector<32x128xi32>
    %30 = arith.cmpi sge, %3, %29 : vector<32x128xi32>
    %cst_10 = arith.constant 0.000000e+00 : f32
    %31 = vector.broadcast %cst_10 : f32 to vector<32x128xf32>
    %32 = arith.select %30, %28, %31 : vector<32x128xi1>, vector<32x128xf32>
    %33 = arith.truncf %32 : vector<32x128xf32> to vector<32x128xbf16>
    %c6_i32 = arith.constant 6 : i32
    %34 = tpu.dynamic_rotate %1 by %c6_i32 dim 1 : vector<32x128xf32>, i32 -> vector<32x128xf32>
    %c6_i32_11 = arith.constant 6 : i32
    %35 = vector.broadcast %c6_i32_11 : i32 to vector<32x128xi32>
    %36 = arith.cmpi sge, %3, %35 : vector<32x128xi32>
    %cst_12 = arith.constant 0.000000e+00 : f32
    %37 = vector.broadcast %cst_12 : f32 to vector<32x128xf32>
    %38 = arith.select %36, %34, %37 : vector<32x128xi1>, vector<32x128xf32>
    %39 = arith.truncf %38 : vector<32x128xf32> to vector<32x128xbf16>
    %40 = vector.extract_strided_slice %2 {offsets = [0, 0], sizes = [16, 128], strides = [1, 1]} : vector<32x128xbf16> to vector<16x128xbf16>
    %41 = vector.extract_strided_slice %9 {offsets = [0, 0], sizes = [16, 128], strides = [1, 1]} : vector<32x128xbf16> to vector<16x128xbf16>
    %42 = vector.extract_strided_slice %15 {offsets = [0, 0], sizes = [16, 128], strides = [1, 1]} : vector<32x128xbf16> to vector<16x128xbf16>
    %43 = vector.extract_strided_slice %21 {offsets = [0, 0], sizes = [16, 128], strides = [1, 1]} : vector<32x128xbf16> to vector<16x128xbf16>
    %44 = vector.extract_strided_slice %27 {offsets = [0, 0], sizes = [16, 128], strides = [1, 1]} : vector<32x128xbf16> to vector<16x128xbf16>
    %45 = vector.extract_strided_slice %33 {offsets = [0, 0], sizes = [16, 128], strides = [1, 1]} : vector<32x128xbf16> to vector<16x128xbf16>
    %46 = vector.extract_strided_slice %39 {offsets = [0, 0], sizes = [16, 128], strides = [1, 1]} : vector<32x128xbf16> to vector<16x128xbf16>
    %47 = tpu.concatenate %40, %41, %42, %43, %44, %45, %46 in 0 : vector<16x128xbf16>, vector<16x128xbf16>, vector<16x128xbf16>, vector<16x128xbf16>, vector<16x128xbf16>, vector<16x128xbf16>, vector<16x128xbf16> -> vector<112x128xbf16>
    %c0_13 = arith.constant 0 : index
    %c0_14 = arith.constant 0 : index
    %48 = vector.load %arg2[%c0_13, %c0_14] : memref<16x112xbf16, #tpu.memory_space<vmem>>, vector<16x112xbf16>
    %cst_15 = arith.constant dense<0.000000e+00> : vector<16x128xf32>
    %49 = tpu.matmul %48, %47, %cst_15 {dimension_numbers = #tpu.dot_dimension_numbers<[1], [0], [0], [1], [0, 0, 1, 1], [], []>} : vector<16x112xbf16>, vector<112x128xbf16>, vector<16x128xf32> -> vector<16x128xf32>
    %c0_16 = arith.constant 0 : index
    %c0_17 = arith.constant 0 : index
    %50 = vector.load %arg3[%c0_16, %c0_17] : memref<16x1xf32, #tpu.memory_space<vmem>>, vector<16x1xf32>
    %51 = vector.broadcast %50 : vector<16x1xf32> to vector<16x128xf32>
    %52 = arith.addf %49, %51 : vector<16x128xf32>
    %53 = vector.extract_strided_slice %2 {offsets = [16, 0], sizes = [16, 128], strides = [1, 1]} : vector<32x128xbf16> to vector<16x128xbf16>
    %54 = vector.extract_strided_slice %9 {offsets = [16, 0], sizes = [16, 128], strides = [1, 1]} : vector<32x128xbf16> to vector<16x128xbf16>
    %55 = vector.extract_strided_slice %15 {offsets = [16, 0], sizes = [16, 128], strides = [1, 1]} : vector<32x128xbf16> to vector<16x128xbf16>
    %56 = vector.extract_strided_slice %21 {offsets = [16, 0], sizes = [16, 128], strides = [1, 1]} : vector<32x128xbf16> to vector<16x128xbf16>
    %57 = vector.extract_strided_slice %27 {offsets = [16, 0], sizes = [16, 128], strides = [1, 1]} : vector<32x128xbf16> to vector<16x128xbf16>
    %58 = vector.extract_strided_slice %33 {offsets = [16, 0], sizes = [16, 128], strides = [1, 1]} : vector<32x128xbf16> to vector<16x128xbf16>
    %59 = vector.extract_strided_slice %39 {offsets = [16, 0], sizes = [16, 128], strides = [1, 1]} : vector<32x128xbf16> to vector<16x128xbf16>
    %60 = tpu.concatenate %53, %54, %55, %56, %57, %58, %59 in 0 : vector<16x128xbf16>, vector<16x128xbf16>, vector<16x128xbf16>, vector<16x128xbf16>, vector<16x128xbf16>, vector<16x128xbf16>, vector<16x128xbf16> -> vector<112x128xbf16>
    %c0_18 = arith.constant 0 : index
    %c0_19 = arith.constant 0 : index
    %61 = vector.load %arg2[%c0_18, %c0_19] : memref<16x112xbf16, #tpu.memory_space<vmem>>, vector<16x112xbf16>
    %cst_20 = arith.constant dense<0.000000e+00> : vector<16x128xf32>
    %62 = tpu.matmul %61, %60, %cst_20 {dimension_numbers = #tpu.dot_dimension_numbers<[1], [0], [0], [1], [0, 0, 1, 1], [], []>} : vector<16x112xbf16>, vector<112x128xbf16>, vector<16x128xf32> -> vector<16x128xf32>
    %c0_21 = arith.constant 0 : index
    %c0_22 = arith.constant 0 : index
    %63 = vector.load %arg3[%c0_21, %c0_22] : memref<16x1xf32, #tpu.memory_space<vmem>>, vector<16x1xf32>
    %64 = vector.broadcast %63 : vector<16x1xf32> to vector<16x128xf32>
    %65 = arith.addf %62, %64 : vector<16x128xf32>
    %66 = tpu.concatenate %52, %65 in 0 : vector<16x128xf32>, vector<16x128xf32> -> vector<32x128xf32>
    %67 = arith.truncf %66 : vector<32x128xf32> to vector<32x128xbf16>
    %c0_23 = arith.constant 0 : index
    %c0_24 = arith.constant 0 : index
    %68 = vector.load %arg4[%c0_23, %c0_24] : memref<128x512xbf16, #tpu.memory_space<vmem>>, vector<128x128xbf16>
    %cst_25 = arith.constant dense<0.000000e+00> : vector<32x128xf32>
    %69 = tpu.matmul %67, %68, %cst_25 {dimension_numbers = #tpu.dot_dimension_numbers<[1], [0], [0], [1], [0, 0, 1, 1], [], []>} : vector<32x128xbf16>, vector<128x128xbf16>, vector<32x128xf32> -> vector<32x128xf32>
    %c0_26 = arith.constant 0 : index
    %c0_27 = arith.constant 0 : index
    %70 = vector.load %arg5[%c0_26, %c0_27] : memref<7x128xf32, #tpu.memory_space<vmem>>, vector<1x128xf32>
    %71 = vector.broadcast %70 : vector<1x128xf32> to vector<32x128xf32>
    %72 = arith.addf %69, %71 : vector<32x128xf32>
    %c0_28 = arith.constant 0 : index
    %c128 = arith.constant 128 : index
    %73 = vector.load %arg4[%c0_28, %c128] : memref<128x512xbf16, #tpu.memory_space<vmem>>, vector<128x256xbf16>
    %cst_29 = arith.constant dense<0.000000e+00> : vector<32x256xf32>
    %74 = tpu.matmul %2, %73, %cst_29 {dimension_numbers = #tpu.dot_dimension_numbers<[1], [0], [0], [1], [0, 0, 1, 1], [], []>} : vector<32x128xbf16>, vector<128x256xbf16>, vector<32x256xf32> -> vector<32x256xf32>
    %75 = vector.extract_strided_slice %74 {offsets = [0, 0], sizes = [32, 128], strides = [1, 1]} : vector<32x256xf32> to vector<32x128xf32>
    %c1 = arith.constant 1 : index
    %c0_30 = arith.constant 0 : index
    %76 = vector.load %arg5[%c1, %c0_30] : memref<7x128xf32, #tpu.memory_space<vmem>>, vector<1x128xf32>
    %77 = vector.broadcast %76 : vector<1x128xf32> to vector<32x128xf32>
    %78 = arith.addf %75, %77 : vector<32x128xf32>
    %79 = vector.extract_strided_slice %74 {offsets = [0, 128], sizes = [32, 128], strides = [1, 1]} : vector<32x256xf32> to vector<32x128xf32>
    %c2 = arith.constant 2 : index
    %c0_31 = arith.constant 0 : index
    %80 = vector.load %arg5[%c2, %c0_31] : memref<7x128xf32, #tpu.memory_space<vmem>>, vector<1x128xf32>
    %81 = vector.broadcast %80 : vector<1x128xf32> to vector<32x128xf32>
    %82 = arith.addf %79, %81 : vector<32x128xf32>
    %83 = arith.truncf %72 : vector<32x128xf32> to vector<32x128xbf16>
    %84 = arith.truncf %78 : vector<32x128xf32> to vector<32x128xbf16>
    %85 = arith.truncf %82 : vector<32x128xf32> to vector<32x128xbf16>
    %cst_32 = arith.constant 0.000000e+00 : f32
    %86 = vector.broadcast %cst_32 : f32 to vector<16x128xf32>
    %87 = vector.extract_strided_slice %83 {offsets = [0, 0], sizes = [16, 32], strides = [1, 1]} : vector<32x128xbf16> to vector<16x32xbf16>
    %88 = vector.extract_strided_slice %84 {offsets = [0, 0], sizes = [16, 32], strides = [1, 1]} : vector<32x128xbf16> to vector<16x32xbf16>
    %89 = vector.extract_strided_slice %85 {offsets = [0, 0], sizes = [16, 32], strides = [1, 1]} : vector<32x128xbf16> to vector<16x32xbf16>
    %cst_33 = arith.constant dense<0.000000e+00> : vector<16x16xf32>
    %90 = tpu.matmul %87, %88, %cst_33 {dimension_numbers = #tpu.dot_dimension_numbers<[1], [1], [0], [0], [0, 0, 1, 0], [], []>} : vector<16x32xbf16>, vector<16x32xbf16>, vector<16x16xf32> -> vector<16x16xf32>
    %cst_34 = arith.constant 0.176776692 : f32
    %91 = vector.broadcast %cst_34 : f32 to vector<16x16xf32>
    %92 = arith.mulf %90, %91 : vector<16x16xf32>
    %cst_35 = arith.constant dense<0xFF800000> : vector<16xf32>
    %93 = vector.multi_reduction <maximumf>, %92, %cst_35 [1] : vector<16x16xf32> to vector<16xf32>
    %94 = vector.shape_cast %93 : vector<16xf32> to vector<16x1xf32>
    %95 = vector.broadcast %94 : vector<16x1xf32> to vector<16x16xf32>
    %96 = arith.subf %92, %95 : vector<16x16xf32>
    %97 = math.exp %96 : vector<16x16xf32>
    %cst_36 = arith.constant dense<0.000000e+00> : vector<16xf32>
    %98 = vector.multi_reduction <add>, %97, %cst_36 [1] : vector<16x16xf32> to vector<16xf32>
    %99 = vector.shape_cast %98 : vector<16xf32> to vector<16x1xf32>
    %100 = tpu.reciprocal %99 {approx = true} : vector<16x1xf32> -> vector<16x1xf32>
    %101 = vector.broadcast %100 : vector<16x1xf32> to vector<16x16xf32>
    %102 = arith.mulf %97, %101 : vector<16x16xf32>
    %103 = arith.truncf %102 : vector<16x16xf32> to vector<16x16xbf16>
    %cst_37 = arith.constant dense<0.000000e+00> : vector<16x32xf32>
    %104 = tpu.matmul %103, %89, %cst_37 {dimension_numbers = #tpu.dot_dimension_numbers<[1], [0], [0], [1], [0, 0, 1, 1], [], []>} : vector<16x16xbf16>, vector<16x32xbf16>, vector<16x32xf32> -> vector<16x32xf32>
    %105 = arith.truncf %104 : vector<16x32xf32> to vector<16x32xbf16>
    %c0_38 = arith.constant 0 : index
    %c384 = arith.constant 384 : index
    %106 = vector.load %arg4[%c0_38, %c384] : memref<128x512xbf16, #tpu.memory_space<vmem>>, vector<32x128xbf16>
    %cst_39 = arith.constant dense<0.000000e+00> : vector<16x128xf32>
    %107 = tpu.matmul %105, %106, %cst_39 {dimension_numbers = #tpu.dot_dimension_numbers<[1], [0], [0], [1], [0, 0, 1, 1], [], []>} : vector<16x32xbf16>, vector<32x128xbf16>, vector<16x128xf32> -> vector<16x128xf32>
    %108 = arith.addf %86, %107 : vector<16x128xf32>
    %109 = vector.extract_strided_slice %83 {offsets = [0, 32], sizes = [16, 32], strides = [1, 1]} : vector<32x128xbf16> to vector<16x32xbf16>
    %110 = vector.extract_strided_slice %84 {offsets = [0, 32], sizes = [16, 32], strides = [1, 1]} : vector<32x128xbf16> to vector<16x32xbf16>
    %111 = vector.extract_strided_slice %85 {offsets = [0, 32], sizes = [16, 32], strides = [1, 1]} : vector<32x128xbf16> to vector<16x32xbf16>
    %cst_40 = arith.constant dense<0.000000e+00> : vector<16x16xf32>
    %112 = tpu.matmul %109, %110, %cst_40 {dimension_numbers = #tpu.dot_dimension_numbers<[1], [1], [0], [0], [0, 0, 1, 0], [], []>} : vector<16x32xbf16>, vector<16x32xbf16>, vector<16x16xf32> -> vector<16x16xf32>
    %cst_41 = arith.constant 0.176776692 : f32
    %113 = vector.broadcast %cst_41 : f32 to vector<16x16xf32>
    %114 = arith.mulf %112, %113 : vector<16x16xf32>
    %cst_42 = arith.constant dense<0xFF800000> : vector<16xf32>
    %115 = vector.multi_reduction <maximumf>, %114, %cst_42 [1] : vector<16x16xf32> to vector<16xf32>
    %116 = vector.shape_cast %115 : vector<16xf32> to vector<16x1xf32>
    %117 = vector.broadcast %116 : vector<16x1xf32> to vector<16x16xf32>
    %118 = arith.subf %114, %117 : vector<16x16xf32>
    %119 = math.exp %118 : vector<16x16xf32>
    %cst_43 = arith.constant dense<0.000000e+00> : vector<16xf32>
    %120 = vector.multi_reduction <add>, %119, %cst_43 [1] : vector<16x16xf32> to vector<16xf32>
    %121 = vector.shape_cast %120 : vector<16xf32> to vector<16x1xf32>
    %122 = tpu.reciprocal %121 {approx = true} : vector<16x1xf32> -> vector<16x1xf32>
    %123 = vector.broadcast %122 : vector<16x1xf32> to vector<16x16xf32>
    %124 = arith.mulf %119, %123 : vector<16x16xf32>
    %125 = arith.truncf %124 : vector<16x16xf32> to vector<16x16xbf16>
    %cst_44 = arith.constant dense<0.000000e+00> : vector<16x32xf32>
    %126 = tpu.matmul %125, %111, %cst_44 {dimension_numbers = #tpu.dot_dimension_numbers<[1], [0], [0], [1], [0, 0, 1, 1], [], []>} : vector<16x16xbf16>, vector<16x32xbf16>, vector<16x32xf32> -> vector<16x32xf32>
    %127 = arith.truncf %126 : vector<16x32xf32> to vector<16x32xbf16>
    %c32 = arith.constant 32 : index
    %c384_45 = arith.constant 384 : index
    %128 = vector.load %arg4[%c32, %c384_45] : memref<128x512xbf16, #tpu.memory_space<vmem>>, vector<32x128xbf16>
    %cst_46 = arith.constant dense<0.000000e+00> : vector<16x128xf32>
    %129 = tpu.matmul %127, %128, %cst_46 {dimension_numbers = #tpu.dot_dimension_numbers<[1], [0], [0], [1], [0, 0, 1, 1], [], []>} : vector<16x32xbf16>, vector<32x128xbf16>, vector<16x128xf32> -> vector<16x128xf32>
    %130 = arith.addf %108, %129 : vector<16x128xf32>
    %131 = vector.extract_strided_slice %83 {offsets = [0, 64], sizes = [16, 32], strides = [1, 1]} : vector<32x128xbf16> to vector<16x32xbf16>
    %132 = vector.extract_strided_slice %84 {offsets = [0, 64], sizes = [16, 32], strides = [1, 1]} : vector<32x128xbf16> to vector<16x32xbf16>
    %133 = vector.extract_strided_slice %85 {offsets = [0, 64], sizes = [16, 32], strides = [1, 1]} : vector<32x128xbf16> to vector<16x32xbf16>
    %cst_47 = arith.constant dense<0.000000e+00> : vector<16x16xf32>
    %134 = tpu.matmul %131, %132, %cst_47 {dimension_numbers = #tpu.dot_dimension_numbers<[1], [1], [0], [0], [0, 0, 1, 0], [], []>} : vector<16x32xbf16>, vector<16x32xbf16>, vector<16x16xf32> -> vector<16x16xf32>
    %cst_48 = arith.constant 0.176776692 : f32
    %135 = vector.broadcast %cst_48 : f32 to vector<16x16xf32>
    %136 = arith.mulf %134, %135 : vector<16x16xf32>
    %cst_49 = arith.constant dense<0xFF800000> : vector<16xf32>
    %137 = vector.multi_reduction <maximumf>, %136, %cst_49 [1] : vector<16x16xf32> to vector<16xf32>
    %138 = vector.shape_cast %137 : vector<16xf32> to vector<16x1xf32>
    %139 = vector.broadcast %138 : vector<16x1xf32> to vector<16x16xf32>
    %140 = arith.subf %136, %139 : vector<16x16xf32>
    %141 = math.exp %140 : vector<16x16xf32>
    %cst_50 = arith.constant dense<0.000000e+00> : vector<16xf32>
    %142 = vector.multi_reduction <add>, %141, %cst_50 [1] : vector<16x16xf32> to vector<16xf32>
    %143 = vector.shape_cast %142 : vector<16xf32> to vector<16x1xf32>
    %144 = tpu.reciprocal %143 {approx = true} : vector<16x1xf32> -> vector<16x1xf32>
    %145 = vector.broadcast %144 : vector<16x1xf32> to vector<16x16xf32>
    %146 = arith.mulf %141, %145 : vector<16x16xf32>
    %147 = arith.truncf %146 : vector<16x16xf32> to vector<16x16xbf16>
    %cst_51 = arith.constant dense<0.000000e+00> : vector<16x32xf32>
    %148 = tpu.matmul %147, %133, %cst_51 {dimension_numbers = #tpu.dot_dimension_numbers<[1], [0], [0], [1], [0, 0, 1, 1], [], []>} : vector<16x16xbf16>, vector<16x32xbf16>, vector<16x32xf32> -> vector<16x32xf32>
    %149 = arith.truncf %148 : vector<16x32xf32> to vector<16x32xbf16>
    %c64 = arith.constant 64 : index
    %c384_52 = arith.constant 384 : index
    %150 = vector.load %arg4[%c64, %c384_52] : memref<128x512xbf16, #tpu.memory_space<vmem>>, vector<32x128xbf16>
    %cst_53 = arith.constant dense<0.000000e+00> : vector<16x128xf32>
    %151 = tpu.matmul %149, %150, %cst_53 {dimension_numbers = #tpu.dot_dimension_numbers<[1], [0], [0], [1], [0, 0, 1, 1], [], []>} : vector<16x32xbf16>, vector<32x128xbf16>, vector<16x128xf32> -> vector<16x128xf32>
    %152 = arith.addf %130, %151 : vector<16x128xf32>
    %153 = vector.extract_strided_slice %83 {offsets = [0, 96], sizes = [16, 32], strides = [1, 1]} : vector<32x128xbf16> to vector<16x32xbf16>
    %154 = vector.extract_strided_slice %84 {offsets = [0, 96], sizes = [16, 32], strides = [1, 1]} : vector<32x128xbf16> to vector<16x32xbf16>
    %155 = vector.extract_strided_slice %85 {offsets = [0, 96], sizes = [16, 32], strides = [1, 1]} : vector<32x128xbf16> to vector<16x32xbf16>
    %cst_54 = arith.constant dense<0.000000e+00> : vector<16x16xf32>
    %156 = tpu.matmul %153, %154, %cst_54 {dimension_numbers = #tpu.dot_dimension_numbers<[1], [1], [0], [0], [0, 0, 1, 0], [], []>} : vector<16x32xbf16>, vector<16x32xbf16>, vector<16x16xf32> -> vector<16x16xf32>
    %cst_55 = arith.constant 0.176776692 : f32
    %157 = vector.broadcast %cst_55 : f32 to vector<16x16xf32>
    %158 = arith.mulf %156, %157 : vector<16x16xf32>
    %cst_56 = arith.constant dense<0xFF800000> : vector<16xf32>
    %159 = vector.multi_reduction <maximumf>, %158, %cst_56 [1] : vector<16x16xf32> to vector<16xf32>
    %160 = vector.shape_cast %159 : vector<16xf32> to vector<16x1xf32>
    %161 = vector.broadcast %160 : vector<16x1xf32> to vector<16x16xf32>
    %162 = arith.subf %158, %161 : vector<16x16xf32>
    %163 = math.exp %162 : vector<16x16xf32>
    %cst_57 = arith.constant dense<0.000000e+00> : vector<16xf32>
    %164 = vector.multi_reduction <add>, %163, %cst_57 [1] : vector<16x16xf32> to vector<16xf32>
    %165 = vector.shape_cast %164 : vector<16xf32> to vector<16x1xf32>
    %166 = tpu.reciprocal %165 {approx = true} : vector<16x1xf32> -> vector<16x1xf32>
    %167 = vector.broadcast %166 : vector<16x1xf32> to vector<16x16xf32>
    %168 = arith.mulf %163, %167 : vector<16x16xf32>
    %169 = arith.truncf %168 : vector<16x16xf32> to vector<16x16xbf16>
    %cst_58 = arith.constant dense<0.000000e+00> : vector<16x32xf32>
    %170 = tpu.matmul %169, %155, %cst_58 {dimension_numbers = #tpu.dot_dimension_numbers<[1], [0], [0], [1], [0, 0, 1, 1], [], []>} : vector<16x16xbf16>, vector<16x32xbf16>, vector<16x32xf32> -> vector<16x32xf32>
    %171 = arith.truncf %170 : vector<16x32xf32> to vector<16x32xbf16>
    %c96 = arith.constant 96 : index
    %c384_59 = arith.constant 384 : index
    %172 = vector.load %arg4[%c96, %c384_59] : memref<128x512xbf16, #tpu.memory_space<vmem>>, vector<32x128xbf16>
    %cst_60 = arith.constant dense<0.000000e+00> : vector<16x128xf32>
    %173 = tpu.matmul %171, %172, %cst_60 {dimension_numbers = #tpu.dot_dimension_numbers<[1], [0], [0], [1], [0, 0, 1, 1], [], []>} : vector<16x32xbf16>, vector<32x128xbf16>, vector<16x128xf32> -> vector<16x128xf32>
    %174 = arith.addf %152, %173 : vector<16x128xf32>
    %cst_61 = arith.constant 0.000000e+00 : f32
    %175 = vector.broadcast %cst_61 : f32 to vector<16x128xf32>
    %176 = vector.extract_strided_slice %83 {offsets = [16, 0], sizes = [16, 32], strides = [1, 1]} : vector<32x128xbf16> to vector<16x32xbf16>
    %177 = vector.extract_strided_slice %84 {offsets = [16, 0], sizes = [16, 32], strides = [1, 1]} : vector<32x128xbf16> to vector<16x32xbf16>
    %178 = vector.extract_strided_slice %85 {offsets = [16, 0], sizes = [16, 32], strides = [1, 1]} : vector<32x128xbf16> to vector<16x32xbf16>
    %cst_62 = arith.constant dense<0.000000e+00> : vector<16x16xf32>
    %179 = tpu.matmul %176, %177, %cst_62 {dimension_numbers = #tpu.dot_dimension_numbers<[1], [1], [0], [0], [0, 0, 1, 0], [], []>} : vector<16x32xbf16>, vector<16x32xbf16>, vector<16x16xf32> -> vector<16x16xf32>
    %cst_63 = arith.constant 0.176776692 : f32
    %180 = vector.broadcast %cst_63 : f32 to vector<16x16xf32>
    %181 = arith.mulf %179, %180 : vector<16x16xf32>
    %cst_64 = arith.constant dense<0xFF800000> : vector<16xf32>
    %182 = vector.multi_reduction <maximumf>, %181, %cst_64 [1] : vector<16x16xf32> to vector<16xf32>
    %183 = vector.shape_cast %182 : vector<16xf32> to vector<16x1xf32>
    %184 = vector.broadcast %183 : vector<16x1xf32> to vector<16x16xf32>
    %185 = arith.subf %181, %184 : vector<16x16xf32>
    %186 = math.exp %185 : vector<16x16xf32>
    %cst_65 = arith.constant dense<0.000000e+00> : vector<16xf32>
    %187 = vector.multi_reduction <add>, %186, %cst_65 [1] : vector<16x16xf32> to vector<16xf32>
    %188 = vector.shape_cast %187 : vector<16xf32> to vector<16x1xf32>
    %189 = tpu.reciprocal %188 {approx = true} : vector<16x1xf32> -> vector<16x1xf32>
    %190 = vector.broadcast %189 : vector<16x1xf32> to vector<16x16xf32>
    %191 = arith.mulf %186, %190 : vector<16x16xf32>
    %192 = arith.truncf %191 : vector<16x16xf32> to vector<16x16xbf16>
    %cst_66 = arith.constant dense<0.000000e+00> : vector<16x32xf32>
    %193 = tpu.matmul %192, %178, %cst_66 {dimension_numbers = #tpu.dot_dimension_numbers<[1], [0], [0], [1], [0, 0, 1, 1], [], []>} : vector<16x16xbf16>, vector<16x32xbf16>, vector<16x32xf32> -> vector<16x32xf32>
    %194 = arith.truncf %193 : vector<16x32xf32> to vector<16x32xbf16>
    %c0_67 = arith.constant 0 : index
    %c384_68 = arith.constant 384 : index
    %195 = vector.load %arg4[%c0_67, %c384_68] : memref<128x512xbf16, #tpu.memory_space<vmem>>, vector<32x128xbf16>
    %cst_69 = arith.constant dense<0.000000e+00> : vector<16x128xf32>
    %196 = tpu.matmul %194, %195, %cst_69 {dimension_numbers = #tpu.dot_dimension_numbers<[1], [0], [0], [1], [0, 0, 1, 1], [], []>} : vector<16x32xbf16>, vector<32x128xbf16>, vector<16x128xf32> -> vector<16x128xf32>
    %197 = arith.addf %175, %196 : vector<16x128xf32>
    %198 = vector.extract_strided_slice %83 {offsets = [16, 32], sizes = [16, 32], strides = [1, 1]} : vector<32x128xbf16> to vector<16x32xbf16>
    %199 = vector.extract_strided_slice %84 {offsets = [16, 32], sizes = [16, 32], strides = [1, 1]} : vector<32x128xbf16> to vector<16x32xbf16>
    %200 = vector.extract_strided_slice %85 {offsets = [16, 32], sizes = [16, 32], strides = [1, 1]} : vector<32x128xbf16> to vector<16x32xbf16>
    %cst_70 = arith.constant dense<0.000000e+00> : vector<16x16xf32>
    %201 = tpu.matmul %198, %199, %cst_70 {dimension_numbers = #tpu.dot_dimension_numbers<[1], [1], [0], [0], [0, 0, 1, 0], [], []>} : vector<16x32xbf16>, vector<16x32xbf16>, vector<16x16xf32> -> vector<16x16xf32>
    %cst_71 = arith.constant 0.176776692 : f32
    %202 = vector.broadcast %cst_71 : f32 to vector<16x16xf32>
    %203 = arith.mulf %201, %202 : vector<16x16xf32>
    %cst_72 = arith.constant dense<0xFF800000> : vector<16xf32>
    %204 = vector.multi_reduction <maximumf>, %203, %cst_72 [1] : vector<16x16xf32> to vector<16xf32>
    %205 = vector.shape_cast %204 : vector<16xf32> to vector<16x1xf32>
    %206 = vector.broadcast %205 : vector<16x1xf32> to vector<16x16xf32>
    %207 = arith.subf %203, %206 : vector<16x16xf32>
    %208 = math.exp %207 : vector<16x16xf32>
    %cst_73 = arith.constant dense<0.000000e+00> : vector<16xf32>
    %209 = vector.multi_reduction <add>, %208, %cst_73 [1] : vector<16x16xf32> to vector<16xf32>
    %210 = vector.shape_cast %209 : vector<16xf32> to vector<16x1xf32>
    %211 = tpu.reciprocal %210 {approx = true} : vector<16x1xf32> -> vector<16x1xf32>
    %212 = vector.broadcast %211 : vector<16x1xf32> to vector<16x16xf32>
    %213 = arith.mulf %208, %212 : vector<16x16xf32>
    %214 = arith.truncf %213 : vector<16x16xf32> to vector<16x16xbf16>
    %cst_74 = arith.constant dense<0.000000e+00> : vector<16x32xf32>
    %215 = tpu.matmul %214, %200, %cst_74 {dimension_numbers = #tpu.dot_dimension_numbers<[1], [0], [0], [1], [0, 0, 1, 1], [], []>} : vector<16x16xbf16>, vector<16x32xbf16>, vector<16x32xf32> -> vector<16x32xf32>
    %216 = arith.truncf %215 : vector<16x32xf32> to vector<16x32xbf16>
    %c32_75 = arith.constant 32 : index
    %c384_76 = arith.constant 384 : index
    %217 = vector.load %arg4[%c32_75, %c384_76] : memref<128x512xbf16, #tpu.memory_space<vmem>>, vector<32x128xbf16>
    %cst_77 = arith.constant dense<0.000000e+00> : vector<16x128xf32>
    %218 = tpu.matmul %216, %217, %cst_77 {dimension_numbers = #tpu.dot_dimension_numbers<[1], [0], [0], [1], [0, 0, 1, 1], [], []>} : vector<16x32xbf16>, vector<32x128xbf16>, vector<16x128xf32> -> vector<16x128xf32>
    %219 = arith.addf %197, %218 : vector<16x128xf32>
    %220 = vector.extract_strided_slice %83 {offsets = [16, 64], sizes = [16, 32], strides = [1, 1]} : vector<32x128xbf16> to vector<16x32xbf16>
    %221 = vector.extract_strided_slice %84 {offsets = [16, 64], sizes = [16, 32], strides = [1, 1]} : vector<32x128xbf16> to vector<16x32xbf16>
    %222 = vector.extract_strided_slice %85 {offsets = [16, 64], sizes = [16, 32], strides = [1, 1]} : vector<32x128xbf16> to vector<16x32xbf16>
    %cst_78 = arith.constant dense<0.000000e+00> : vector<16x16xf32>
    %223 = tpu.matmul %220, %221, %cst_78 {dimension_numbers = #tpu.dot_dimension_numbers<[1], [1], [0], [0], [0, 0, 1, 0], [], []>} : vector<16x32xbf16>, vector<16x32xbf16>, vector<16x16xf32> -> vector<16x16xf32>
    %cst_79 = arith.constant 0.176776692 : f32
    %224 = vector.broadcast %cst_79 : f32 to vector<16x16xf32>
    %225 = arith.mulf %223, %224 : vector<16x16xf32>
    %cst_80 = arith.constant dense<0xFF800000> : vector<16xf32>
    %226 = vector.multi_reduction <maximumf>, %225, %cst_80 [1] : vector<16x16xf32> to vector<16xf32>
    %227 = vector.shape_cast %226 : vector<16xf32> to vector<16x1xf32>
    %228 = vector.broadcast %227 : vector<16x1xf32> to vector<16x16xf32>
    %229 = arith.subf %225, %228 : vector<16x16xf32>
    %230 = math.exp %229 : vector<16x16xf32>
    %cst_81 = arith.constant dense<0.000000e+00> : vector<16xf32>
    %231 = vector.multi_reduction <add>, %230, %cst_81 [1] : vector<16x16xf32> to vector<16xf32>
    %232 = vector.shape_cast %231 : vector<16xf32> to vector<16x1xf32>
    %233 = tpu.reciprocal %232 {approx = true} : vector<16x1xf32> -> vector<16x1xf32>
    %234 = vector.broadcast %233 : vector<16x1xf32> to vector<16x16xf32>
    %235 = arith.mulf %230, %234 : vector<16x16xf32>
    %236 = arith.truncf %235 : vector<16x16xf32> to vector<16x16xbf16>
    %cst_82 = arith.constant dense<0.000000e+00> : vector<16x32xf32>
    %237 = tpu.matmul %236, %222, %cst_82 {dimension_numbers = #tpu.dot_dimension_numbers<[1], [0], [0], [1], [0, 0, 1, 1], [], []>} : vector<16x16xbf16>, vector<16x32xbf16>, vector<16x32xf32> -> vector<16x32xf32>
    %238 = arith.truncf %237 : vector<16x32xf32> to vector<16x32xbf16>
    %c64_83 = arith.constant 64 : index
    %c384_84 = arith.constant 384 : index
    %239 = vector.load %arg4[%c64_83, %c384_84] : memref<128x512xbf16, #tpu.memory_space<vmem>>, vector<32x128xbf16>
    %cst_85 = arith.constant dense<0.000000e+00> : vector<16x128xf32>
    %240 = tpu.matmul %238, %239, %cst_85 {dimension_numbers = #tpu.dot_dimension_numbers<[1], [0], [0], [1], [0, 0, 1, 1], [], []>} : vector<16x32xbf16>, vector<32x128xbf16>, vector<16x128xf32> -> vector<16x128xf32>
    %241 = arith.addf %219, %240 : vector<16x128xf32>
    %242 = vector.extract_strided_slice %83 {offsets = [16, 96], sizes = [16, 32], strides = [1, 1]} : vector<32x128xbf16> to vector<16x32xbf16>
    %243 = vector.extract_strided_slice %84 {offsets = [16, 96], sizes = [16, 32], strides = [1, 1]} : vector<32x128xbf16> to vector<16x32xbf16>
    %244 = vector.extract_strided_slice %85 {offsets = [16, 96], sizes = [16, 32], strides = [1, 1]} : vector<32x128xbf16> to vector<16x32xbf16>
    %cst_86 = arith.constant dense<0.000000e+00> : vector<16x16xf32>
    %245 = tpu.matmul %242, %243, %cst_86 {dimension_numbers = #tpu.dot_dimension_numbers<[1], [1], [0], [0], [0, 0, 1, 0], [], []>} : vector<16x32xbf16>, vector<16x32xbf16>, vector<16x16xf32> -> vector<16x16xf32>
    %cst_87 = arith.constant 0.176776692 : f32
    %246 = vector.broadcast %cst_87 : f32 to vector<16x16xf32>
    %247 = arith.mulf %245, %246 : vector<16x16xf32>
    %cst_88 = arith.constant dense<0xFF800000> : vector<16xf32>
    %248 = vector.multi_reduction <maximumf>, %247, %cst_88 [1] : vector<16x16xf32> to vector<16xf32>
    %249 = vector.shape_cast %248 : vector<16xf32> to vector<16x1xf32>
    %250 = vector.broadcast %249 : vector<16x1xf32> to vector<16x16xf32>
    %251 = arith.subf %247, %250 : vector<16x16xf32>
    %252 = math.exp %251 : vector<16x16xf32>
    %cst_89 = arith.constant dense<0.000000e+00> : vector<16xf32>
    %253 = vector.multi_reduction <add>, %252, %cst_89 [1] : vector<16x16xf32> to vector<16xf32>
    %254 = vector.shape_cast %253 : vector<16xf32> to vector<16x1xf32>
    %255 = tpu.reciprocal %254 {approx = true} : vector<16x1xf32> -> vector<16x1xf32>
    %256 = vector.broadcast %255 : vector<16x1xf32> to vector<16x16xf32>
    %257 = arith.mulf %252, %256 : vector<16x16xf32>
    %258 = arith.truncf %257 : vector<16x16xf32> to vector<16x16xbf16>
    %cst_90 = arith.constant dense<0.000000e+00> : vector<16x32xf32>
    %259 = tpu.matmul %258, %244, %cst_90 {dimension_numbers = #tpu.dot_dimension_numbers<[1], [0], [0], [1], [0, 0, 1, 1], [], []>} : vector<16x16xbf16>, vector<16x32xbf16>, vector<16x32xf32> -> vector<16x32xf32>
    %260 = arith.truncf %259 : vector<16x32xf32> to vector<16x32xbf16>
    %c96_91 = arith.constant 96 : index
    %c384_92 = arith.constant 384 : index
    %261 = vector.load %arg4[%c96_91, %c384_92] : memref<128x512xbf16, #tpu.memory_space<vmem>>, vector<32x128xbf16>
    %cst_93 = arith.constant dense<0.000000e+00> : vector<16x128xf32>
    %262 = tpu.matmul %260, %261, %cst_93 {dimension_numbers = #tpu.dot_dimension_numbers<[1], [0], [0], [1], [0, 0, 1, 1], [], []>} : vector<16x32xbf16>, vector<32x128xbf16>, vector<16x128xf32> -> vector<16x128xf32>
    %263 = arith.addf %241, %262 : vector<16x128xf32>
    %264 = tpu.concatenate %174, %263 in 0 : vector<16x128xf32>, vector<16x128xf32> -> vector<32x128xf32>
    %c3 = arith.constant 3 : index
    %c0_94 = arith.constant 0 : index
    %265 = vector.load %arg5[%c3, %c0_94] : memref<7x128xf32, #tpu.memory_space<vmem>>, vector<1x128xf32>
    %266 = vector.broadcast %265 : vector<1x128xf32> to vector<32x128xf32>
    %267 = arith.addf %264, %266 : vector<32x128xf32>
    %268 = arith.addf %66, %267 : vector<32x128xf32>
    %cst_95 = arith.constant dense<0.000000e+00> : vector<32xf32>
    %269 = vector.multi_reduction <add>, %268, %cst_95 [1] : vector<32x128xf32> to vector<32xf32>
    %270 = vector.shape_cast %269 : vector<32xf32> to vector<32x1xf32>
    %cst_96 = arith.constant 1.280000e+02 : f32
    %271 = vector.broadcast %cst_96 : f32 to vector<32x1xf32>
    %272 = arith.divf %270, %271 : vector<32x1xf32>
    %273 = vector.broadcast %272 : vector<32x1xf32> to vector<32x128xf32>
    %274 = arith.subf %268, %273 : vector<32x128xf32>
    %275 = arith.mulf %274, %274 : vector<32x128xf32>
    %cst_97 = arith.constant dense<0.000000e+00> : vector<32xf32>
    %276 = vector.multi_reduction <add>, %275, %cst_97 [1] : vector<32x128xf32> to vector<32xf32>
    %277 = vector.shape_cast %276 : vector<32xf32> to vector<32x1xf32>
    %cst_98 = arith.constant 1.280000e+02 : f32
    %278 = vector.broadcast %cst_98 : f32 to vector<32x1xf32>
    %279 = arith.divf %277, %278 : vector<32x1xf32>
    %cst_99 = arith.constant 1.00787401 : f32
    %280 = vector.broadcast %cst_99 : f32 to vector<32x1xf32>
    %281 = arith.mulf %279, %280 : vector<32x1xf32>
    %282 = math.sqrt %281 : vector<32x1xf32>
    %c4 = arith.constant 4 : index
    %c0_100 = arith.constant 0 : index
    %283 = vector.load %arg5[%c4, %c0_100] : memref<7x128xf32, #tpu.memory_space<vmem>>, vector<1x128xf32>
    %284 = vector.broadcast %283 : vector<1x128xf32> to vector<32x128xf32>
    %285 = arith.mulf %284, %274 : vector<32x128xf32>
    %cst_101 = arith.constant 9.99999997E-7 : f32
    %286 = vector.broadcast %cst_101 : f32 to vector<32x1xf32>
    %287 = arith.addf %282, %286 : vector<32x1xf32>
    %288 = tpu.reciprocal %287 {approx = true} : vector<32x1xf32> -> vector<32x1xf32>
    %289 = vector.broadcast %288 : vector<32x1xf32> to vector<32x128xf32>
    %290 = arith.mulf %285, %289 : vector<32x128xf32>
    %c5 = arith.constant 5 : index
    %c0_102 = arith.constant 0 : index
    %291 = vector.load %arg5[%c5, %c0_102] : memref<7x128xf32, #tpu.memory_space<vmem>>, vector<1x128xf32>
    %292 = vector.broadcast %291 : vector<1x128xf32> to vector<32x128xf32>
    %293 = arith.addf %290, %292 : vector<32x128xf32>
    %294 = arith.truncf %293 : vector<32x128xf32> to vector<32x128xbf16>
    %c0_103 = arith.constant 0 : index
    %c0_104 = arith.constant 0 : index
    %295 = vector.load %arg6[%c0_103, %c0_104] : memref<128x256xbf16, #tpu.memory_space<vmem>>, vector<128x256xbf16>
    %cst_105 = arith.constant dense<0.000000e+00> : vector<32x256xf32>
    %296 = tpu.matmul %294, %295, %cst_105 {dimension_numbers = #tpu.dot_dimension_numbers<[1], [0], [0], [1], [0, 0, 1, 1], [], []>} : vector<32x128xbf16>, vector<128x256xbf16>, vector<32x256xf32> -> vector<32x256xf32>
    %c0_106 = arith.constant 0 : index
    %c0_107 = arith.constant 0 : index
    %297 = vector.load %arg7[%c0_106, %c0_107] : memref<1x256xf32, #tpu.memory_space<vmem>>, vector<1x256xf32>
    %298 = vector.broadcast %297 : vector<1x256xf32> to vector<32x256xf32>
    %299 = arith.addf %296, %298 : vector<32x256xf32>
    %cst_108 = arith.constant 0.000000e+00 : f32
    %300 = vector.broadcast %cst_108 : f32 to vector<32x256xf32>
    %301 = arith.maximumf %299, %300 : vector<32x256xf32>
    %302 = arith.truncf %301 : vector<32x256xf32> to vector<32x256xbf16>
    %c0_109 = arith.constant 0 : index
    %c0_110 = arith.constant 0 : index
    %303 = vector.load %arg8[%c0_109, %c0_110] : memref<256x128xbf16, #tpu.memory_space<vmem>>, vector<256x128xbf16>
    %cst_111 = arith.constant dense<0.000000e+00> : vector<32x128xf32>
    %304 = tpu.matmul %302, %303, %cst_111 {dimension_numbers = #tpu.dot_dimension_numbers<[1], [0], [0], [1], [0, 0, 1, 1], [], []>} : vector<32x256xbf16>, vector<256x128xbf16>, vector<32x128xf32> -> vector<32x128xf32>
    %c6 = arith.constant 6 : index
    %c0_112 = arith.constant 0 : index
    %305 = vector.load %arg5[%c6, %c0_112] : memref<7x128xf32, #tpu.memory_space<vmem>>, vector<1x128xf32>
    %306 = vector.broadcast %305 : vector<1x128xf32> to vector<32x128xf32>
    %307 = arith.addf %304, %306 : vector<32x128xf32>
    %308 = arith.addf %268, %307 : vector<32x128xf32>
    %309 = vector.shape_cast %308 : vector<32x128xf32> to vector<2x16x128xf32>
    %c0_113 = arith.constant 0 : index
    %c0_114 = arith.constant 0 : index
    %c0_115 = arith.constant 0 : index
    %310 = vector.load %arg9[%c0_113, %c0_114, %c0_115] : memref<2x16x128xf32, #tpu.memory_space<vmem>>, vector<2x16x128xf32>
    tpu.vector_store %arg9[%c0_113, %c0_114, %c0_115], %309 {strides = array<i32>} : memref<2x16x128xf32, #tpu.memory_space<vmem>>, vector<2x16x128xf32>,
    return
  }
  func.func @transform_0(%arg0: i32) -> (i32, i32, i32) {
    %c0_i32 = arith.constant 0 : i32
    %c0_i32_0 = arith.constant 0 : i32
    %c0_i32_1 = arith.constant 0 : i32
    return %arg0, %c0_i32, %c0_i32_0 : i32, i32, i32
  }
  func.func @transform_1(%arg0: i32) -> (i32, i32) {
    %c0_i32 = arith.constant 0 : i32
    %c0_i32_0 = arith.constant 0 : i32
    %c0_i32_1 = arith.constant 0 : i32
    return %c0_i32, %c0_i32_0 : i32, i32
  }
  func.func @transform_2(%arg0: i32) -> (i32, i32) {
    %c0_i32 = arith.constant 0 : i32
    %c0_i32_0 = arith.constant 0 : i32
    %c0_i32_1 = arith.constant 0 : i32
    return %c0_i32, %c0_i32_0 : i32, i32
  }
  func.func @transform_3(%arg0: i32) -> (i32, i32) {
    %c0_i32 = arith.constant 0 : i32
    %c0_i32_0 = arith.constant 0 : i32
    %c0_i32_1 = arith.constant 0 : i32
    return %c0_i32, %c0_i32_0 : i32, i32
  }
  func.func @transform_4(%arg0: i32) -> (i32, i32) {
    %c0_i32 = arith.constant 0 : i32
    %c0_i32_0 = arith.constant 0 : i32
    %c0_i32_1 = arith.constant 0 : i32
    return %c0_i32, %c0_i32_0 : i32, i32
  }
  func.func @transform_5(%arg0: i32) -> (i32, i32) {
    %c0_i32 = arith.constant 0 : i32
    %c0_i32_0 = arith.constant 0 : i32
    %c0_i32_1 = arith.constant 0 : i32
    return %c0_i32, %c0_i32_0 : i32, i32
  }
  func.func @transform_6(%arg0: i32) -> (i32, i32) {
    %c0_i32 = arith.constant 0 : i32
    %c0_i32_0 = arith.constant 0 : i32
    %c0_i32_1 = arith.constant 0 : i32
    return %c0_i32, %c0_i32_0 : i32, i32
  }
  func.func @transform_7(%arg0: i32) -> (i32, i32) {
    %c0_i32 = arith.constant 0 : i32
    %c0_i32_0 = arith.constant 0 : i32
    %c0_i32_1 = arith.constant 0 : i32
    return %c0_i32, %c0_i32_0 : i32, i32
  }
  func.func @transform_8(%arg0: i32) -> (i32, i32, i32) {
    %c0_i32 = arith.constant 0 : i32
    %c0_i32_0 = arith.constant 0 : i32
    %c0_i32_1 = arith.constant 0 : i32
    return %arg0, %c0_i32, %c0_i32_0 : i32, i32, i32
  }
}

</mosaic_0001>

<bundles_post_ra>
// kernel: tpu_custom_call.1
= control target key start
LH: loop header
LB: loop body
LE: loop exit
PB: predicated region body
PF: predicated region fallthrough
CT: control target
= control target key end

     0   :  { %s4589_s0 = inlined_call_operand.hbm [shape: f32[4,16,128], index: 0, kind: input, shape index: {}]   ;;  %s4590_s1 = inlined_call_operand.vmem [shape: bf16[16,112], index: 1, kind: input, shape index: {}]   ;;  %s4591_s2 = inlined_call_operand.vmem [shape: f32[16,1], index: 2, kind: input, shape index: {}]   ;;  %s4592_s3 = inlined_call_operand.hbm [shape: bf16[128,512], index: 3, kind: input, shape index: {}]   ;;  %s4593_s4 = inlined_call_operand.vmem [shape: f32[7,128], index: 4, kind: input, shape index: {}]   ;;  %s4594_s5 = inlined_call_operand.hbm [shape: bf16[128,256], index: 5, kind: input, shape index: {}]   ;;  %s4595_s6 = inlined_call_operand.vmem [shape: f32[1,256], index: 6, kind: input, shape index: {}]   ;;  %s4596_s7 = inlined_call_operand.hbm [shape: bf16[256,128], index: 7, kind: input, shape index: {}]   ;;  %s4597_s8 = inlined_call_operand.hbm [shape: f32[4,16,128], index: 8, kind: output, shape index: {}]  }
   0x1   :  { %4604 = sst [smem:[#allocation15_spill]] %s4592_s3 }
   0x2   :  { %4605 = sst [smem:[#allocation16_spill]] %s4594_s5 }
   0x3   :  { %13 = vsyncpa [#allocation3], 0 }
   0x4   :  { %15 = vsyncpa [#allocation3 + $0x1], 0 }
   0x5   :  { %16 = vsyncpa [#allocation6], 0 }
   0x6   :  { %17 = vsyncpa [#allocation9], 0 }
   0x7   :  { %18 = vsyncpa [#allocation4], 0 }
   0x8   :  { %20 = vsyncpa [#allocation4 + $0x1], 0  ;;  %s3924_s27 = smov 0   ;;  %s3926_s28 = smov 0  }
   0x9   :  { %s3928_s29 = smov 0   ;;  %s3930_s30 = smov 0  }
   0xa LB: > { %s3945_s9 = sadd.s32 4294967295, %s3852_s30   ;;  %s2868_s10 = sadd.s32 4294967294, %s3852_s30   ;;  %s3852_s30 = sphi %s3930_s30, %s4639_s30   ;;  %s3848_s29 = sphi %s3928_s29, %s4638_s29   ;;  %s3844_s28 = sphi %s3926_s28, %s4637_s28   ;;  %s3840_s27 = sphi %s3924_s27, %s4636_s27  }
   0xb   : > { %p46_p0 = scmp.ne.s32.totalorder %s3844_s28, %s3840_s27  ;;  %p4598_p1 = scmp.eq.s32.totalorder %s3945_s9, 0 }
   0xc   : > { %p223_p3 = scmp.eq.s32.totalorder %s2868_s10, 1  ;;  %p2869_p5 = scmp.ge.s32.totalorder %s3852_s30, 1 }
   0xd   : > { %p3954_p4 = por %p4598_p1, %p46_p0  ;;  %p230_p7 = scmp.lt.s32.totalorder %s3852_s30, 3 }
   0xe   : > { %p3959_p6 = por %p223_p3, %p46_p0  ;;  %s3854_s14 = smov [#allocation5]  }
   0xf   : > { %s4606_s11 = scalar_select %p3954_p4, 1, 0 }
  0x10   : > { %s4607_s12 = scalar_select %p3959_p6, 1, 0 }
  0x11   : > { %p3964_p8 = pnand %p2869_p5, %p230_p7  ;;  %s248_s15 = sshll.u32 %s3854_s14, 4  ;;  %s249_s15 = int_to_ptr.vmem [resolvable:$true] %s248_s15 }
  0x12   : > { %s3855_s17 = smov [#allocation7]   ;;  %s3685_s19 = scalar_lea.vmem %s249_s15, 4096 }
  0x13   : > { %s4608_s13 = scalar_select %p3964_p8, 1, 0 }
  0x14   : > { %p3370_p9 = pneg %p3964_p8  ;;  %s264_s18 = sshll.u32 %s3855_s17, 4  ;;  %s265_s18 = int_to_ptr.vmem [resolvable:$true] %s264_s18 }
  0x15   : > { %p3686_p13 = scmp.ne.s32.totalorder %s249_s15, %s3685_s19  ;;  %p3693_p5 = scmp.lt.s32.totalorder %s249_s15, %s249_s15 }
  0x16   : > { %p3973_p11 = pnand %p3370_p9, %p4598_p1  ;;  %p3694_p7 = scmp.lt.s32.totalorder %s3685_s19, %s3685_s19 }
  0x18   : > { %p3676_p12 = pneg %p3973_p11  ;;  %p3695_p10 = por %p3694_p7, %p3693_p5 }
  0x1a   : > { %p3688_p0 = pnand %p3686_p13, %p3676_p12 }
  0x1c   : > { %p3689_p3 = pneg %p3688_p0 }
  0x1e   : > { %p3696_p9 = pnand %p3695_p10, %p3689_p3 }
  0x20   : > { %3699 = shalt.err (!%p3696_p9)
}
  0x21   : > { %s3856_s20 = smov 256   ;;  %s3857_s21 = smov 16  }
  0x22   : > { %s4610_s3 = sld [smem:[#allocation15_spill]]  ;;  %s3711_s24 = scalar_lea.vmem %s265_s18, 2048 }
  0x23   : > { %p3712_p1 = scmp.ne.s32.totalorder %s265_s18, %s3711_s24  ;;  %p3719_p2 = scmp.lt.s32.totalorder %s265_s18, %s265_s18 }
  0x24   : > { %p3720_p6 = scmp.lt.s32.totalorder %s3711_s24, %s3711_s24 }
  0x25   : > { %p3714_p13 = pnand %p3712_p1, %p3676_p12 }
  0x26   : > { %p3721_p5 = por %p3720_p6, %p3719_p2 }
  0x27   : > { %p3715_p0 = pneg %p3714_p13 }
  0x28   : > { %3373 = dma.hbm_to_vmem [thread:$0]  (!%p3973_p11), %s4610_s3, 4096, %s249_s15, [#allocation6], %s3856_s20, %s3856_s20, %s3857_s21  }
  0x29   : > { %p3722_p10 = pnand %p3721_p5, %p3715_p0 }
  0x2b   : > { %3725 = shalt.err (!%p3722_p10)
}
  0x2c   : > { %s4599_s25 = smov 128   ;;  %s4600_s26 = smov 8  }
  0x2d   : > { %s4611_s5 = sld [smem:[#allocation16_spill]]  ;;  %s3860_s15 = smov [#allocation8]  }
  0x2e   : > { %s280_s17 = sshll.u32 %s3860_s15, 4  ;;  %s281_s17 = int_to_ptr.vmem [resolvable:$true] %s280_s17 }
  0x2f   : > { %s3737_s19 = scalar_lea.vmem %s281_s17, 2048  ;;  %p3745_p3 = scmp.lt.s32.totalorder %s281_s17, %s281_s17 }
  0x30   : > { %p3738_p1 = scmp.ne.s32.totalorder %s281_s17, %s3737_s19  ;;  %p3746_p7 = scmp.lt.s32.totalorder %s3737_s19, %s3737_s19 }
  0x32   : > { %p3740_p2 = pnand %p3738_p1, %p3676_p12  ;;  %p3747_p9 = por %p3746_p7, %p3745_p3 }
  0x33   : > { %3376 = dma.hbm_to_vmem [thread:$0]  (!%p3973_p11), %s4611_s5, 2048, %s265_s18, [#allocation6], %s4599_s25, %s4599_s25, %s4600_s26  }
  0x34   : > { %p3741_p6 = pneg %p3740_p2 }
  0x36   : > { %p3748_p13 = pnand %p3747_p9, %p3741_p6 }
  0x38   : > { %3751 = shalt.err (!%p3748_p13)
}
  0x39   : > { %s3861_s20 = smov 64   ;;  %s3862_s18 = smov 4  }
  0x3a   : > { %3379 = dma.hbm_to_vmem [thread:$0]  (!%p3973_p11), %s4596_s7, 2048, %s281_s17, [#allocation9], %s3861_s20, %s3861_s20, %s3862_s18  }
  0x3b   : > { %s4007_s23 = sadd.s32 1, %s3852_s30   ;;  %s33_s10 = sadd.s32 1, %s3848_s29 }
  0x3c   : > { %s30_s24 = ssub.s32 %s3852_s30, %s4007_s23  ;;  %p40_p0 = scmp.ne.s32.totalorder %s3848_s29, %s3844_s28 }
  0x3d   : > { %p31_p12 = scmp.eq.s32.totalorder %s30_s24, 0  ;;  %p41_p5 = scmp.eq.s32.totalorder %s3852_s30, 0 }
  0x3e   : > { %p3391_p10 = scmp.lt.s32.totalorder %s3852_s30, 2  ;;  %p4612_p2 = scmp.eq.s32.totalorder %s3945_s9, 1 }
  0x3f   : > { %s4017_s14 = scalar_select %p31_p12, %s3848_s29, %s33_s10  }
  0x40   : > { %p42_p1 = por %p41_p5, %p40_p0  ;;  %p4021_p6 = por %p4612_p2, %p40_p0 }
  0x41   : > { %s294_s16 = sand.u32 1, %s3848_s29   ;;  %s3025_s19 = sshll.u32 %s3852_s30, 9 }
  0x42   : > { %s4613_s15 = scalar_select %p4021_p6, 1, 0 }
  0x43   : > { %s2874_s17 = sshll.u32 %s294_s16, 5  ;;  %s4030_s21 = scalar_lea.hbm %s4589_s0, %s3025_s19 }
  0x44   : > { %s298_s22 = scalar_lea.vmem [#allocation2], %s2874_s17  ;;  %p4032_p11 = pnand %p3391_p10, %p42_p1 }
  0x45   : > { %s306_s24 = sshll.u32 %s298_s22, 4  ;;  %s4038_s25 = scalar_lea.sflag [#allocation3], %s294_s16  ;;  %s4036_s24 = int_to_ptr.vmem [resolvable:$true] %s306_s24 }
  0x46   : > { %s3752_s26 = scalar_lea.hbm %s4030_s21, 512  ;;  %p3754_p7 = pneg %p4032_p11 }
  0x47   : > { %p3753_p3 = scmp.ne.s32.totalorder %s4030_s21, %s3752_s26  ;;  %s3757_s17 = scalar_lea.hbm %s4589_s0, 1024 }
  0x48   : > { %p3758_p12 = scmp.lt.s32.totalorder %s4030_s21, %s4589_s0  ;;  %p3759_p0 = scmp.lt.s32.totalorder %s3757_s17, %s3752_s26 }
  0x49   : > { %p3755_p9 = pnand %p3754_p7, %p3753_p3 }
  0x4a   : > { %p3760_p5 = por %p3759_p0, %p3758_p12 }
  0x4b   : > { %p3756_p13 = pneg %p3755_p9 }
  0x4d   : > { %p3761_p10 = pnand %p3760_p5, %p3756_p13 }
  0x4f   : > { %3764 = shalt.err (!%p3761_p10)
}
  0x50   : > { %s3765_s16 = scalar_lea.vmem %s4036_s24, 512  ;;  %s3863_s3 = smov [#allocation2]  }
  0x51   : > { %p3766_p1 = scmp.ne.s32.totalorder %s4036_s24, %s3765_s16  ;;  %s3770_s5 = sshll.u32 %s3863_s3, 4  ;;  %s3771_s5 = int_to_ptr.vmem [resolvable:$false] %s3770_s5 }
  0x52   : > { %s3772_s19 = scalar_lea.vmem %s3771_s5, 1024  ;;  %p3773_p9 = scmp.lt.s32.totalorder %s4036_s24, %s3771_s5 }
  0x53   : > { %p3768_p2 = pnand %p3766_p1, %p3754_p7  ;;  %p3774_p6 = scmp.lt.s32.totalorder %s3772_s19, %s3765_s16 }
  0x55   : > { %p3769_p3 = pneg %p3768_p2  ;;  %p3775_p4 = por %p3774_p6, %p3773_p9 }
  0x57   : > { %p3776_p8 = pnand %p3775_p4, %p3769_p3 }
  0x59   : > { %3779 = shalt.err (!%p3776_p8)
}
  0x5a   : > { %s4615_s26 = smov 8   ;;  %s4616_s20 = smov 128  }
  0x5b   : > { %3383 = dma.hbm_to_vmem [thread:$0]  (!%p4032_p11), %s4030_s21, 512, %s4036_s24, %s4038_s25, %s4616_s20, %s4616_s20, %s4615_s26  }
  0x5c   : > { %p4617_p7 = scmp.ne.s32.totalorder %s4608_s13, 0 }
  0x5d   : > { %s4065_s3 = sand.u32 (!%p4617_p7), 1, %s3844_s28   ;;  %p4618_p4 = scmp.ne.s32.totalorder (!%p4617_p7), %s4606_s11, 0 }
  0x5e   : > { %318 = sbr.rel (%p4617_p7) target bundleno = 5456 (0x1550), region = 52  ;;  %s2879_s5 = sshll.u32 (!%p4617_p7), %s4065_s3, 5 }
  0x5f   : > { %s321_s17 = scalar_lea.sflag (!%p4617_p7), [#allocation3], %s4065_s3  ;;  %s324_s10 = scalar_lea.vmem (!%p4617_p7), [#allocation2], %s2879_s5 }
  0x63   : > { %3823 = dma.done.wait (%p4618_p4), %s321_s17, 512  }
  0x64   : > { %3825 = vsyncadd (%p4618_p4), %s321_s17, 4294966784  ;;  %p4619_p8 = scmp.eq.s32.totalorder %s3945_s9, 0 }
  0x66   : > { %3827 = dma.done.wait (%p4619_p8), [#allocation6], 6144   ;;  %p4620_p6 = pmov %p4619_p8 }
  0x68   : > { %3829 = vsyncadd (%p4620_p6), [#allocation6], 4294961152  ;;  %p4621_p11 = pmov %p4620_p6 }
  0x69   : > { %p4622_p13 = pmov %p4620_p6 }
  0x6a   : > { %3831 = dma.done.wait (%p4621_p11), [#allocation9], 2048  }
  0x6b   : > { %3833 = vsyncadd (%p4622_p13), [#allocation9], 4294965248  ;;  %v3864_v0 = vmov 0.0   ;;  %v372_v1 = vld [vmem:[%s324_s10] sm:$0xff]  ;;  %v373_v2 = vld [vmem:[%s324_s10 + $0x8] sm:$0xff]  ;;  %s3865_s11 = smov 6   ;;  %v378_v12 = vlaneseq }
  0x6c   : > { %3138 = vmatprep.subr.bf16.mxu0 %v3864_v0  ;;  %3156 = vmatprep.subr.bf16.mxu1 %v3864_v0  ;;  %v374_v3 = vld [vmem:[%s324_s10 + $0x10] sm:$0xff]  ;;  %v3451_v4 = vpack.i.bf16 %v373_v2, %v372_v1  ;;  %v375_v5 = vld [vmem:[%s324_s10 + $0x18] sm:$0xff]  ;;  %s3866_s13 = smov 5   ;;  %s3867_s25 = smov 4   ;;  %v4085_v7 = vpack.c.bf16 %v373_v2, %v372_v1  ;;  %vm3870_vm0 = vmmov 0   ;;  %v472_v9 = vld [vmem:[%s4591_s2] sm:$0xff] }
  0x6d   : > { %v3456_v6 = vpack.i.bf16 %v375_v5, %v374_v3  ;;  %s3868_s21 = smov 3   ;;  %s3869_s24 = smov 2   ;;  %3152 = vmatprep.mubr.msk.bf16.mxu0 %vm3870_vm0, %v3864_v0  ;;  %v4089_v8 = vpack.c.bf16 %v375_v5, %v374_v3  ;;  %3170 = vmatprep.mubr.msk.bf16.mxu1 %vm3870_vm0, %v3864_v0  ;;  %v473_v10 = vld [vmem:[%s4591_s2 + $0x8] sm:$0xff]  ;;  %v3872_v11 = vmov 0   ;;  %v4102_v13 = vand.u32 127, %v378_v12  ;;  %v3513_v5 = vld [vmem:[%s4590_s1] sm:$0xff]  }
  0x6e   : > { %3452 = vrot.lane.b32.xlu0 %v3451_v4, %s3865_s11  ;;  %3462 = vrot.lane.b32.xlu1 %v3451_v4, %s3866_s13  ;;  %s3871_s18 = smov 1   ;;  %vm489_vm13 = vcmask 916480   ;;  %v3542_v20 = vld [vmem:[#allocation5 + $0x60] ss:$16 sps:$4 sm:$0xff]   ;;  %v3537_v29 = vld [vmem:[#allocation5 + $0x4] ss:$16 sps:$4 sm:$0xff]  }
  0x6f   : > { %3511 = vset.pattern.permute.xlu0 %v3872_v11  ;;  %3512 = vset.pattern.permute.xlu1 %v3872_v11  ;;  %vm463_vm1 = vcmp.ge.s32.totalorder %v4102_v13, 6  ;;  %vm448_vm3 = vcmp.ge.s32.totalorder %v4102_v13, 5  ;;  %vm433_vm5 = vcmp.ge.s32.totalorder %v4102_v13, 4  ;;  %vm418_vm7 = vcmp.ge.s32.totalorder %v4102_v13, 3  ;;  %s3874_s22 = smov 64   ;;  %s3875_s16 = smov 32  }
  0x70   : > { %vm4105_vm2 = vmpackc.low %vm463_vm1, %vm463_vm1  ;;  %vm403_vm9 = vcmp.ge.s32.totalorder %v4102_v13, 2  ;;  %vm388_vm11 = vcmp.ge.s32.totalorder %v4102_v13, 1  ;;  %v3519_v13 = vld [vmem:[#allocation5 + $0xc8] ss:$16 sps:$4 sm:$0xff]   ;;  %vm868_vm14 = vcmask 261120   ;;  %vm918_vm15 = vcmask 130048  }
  0x71   : > { %vm4113_vm4 = vmpackc.low %vm448_vm3, %vm448_vm3  ;;  %s2752_s20 = scalar_lea.sflag [#allocation4], %s4065_s3  ;;  %p4633_p0 = scmp.ne.s32.totalorder %s4613_s15, 0 }
  0x72   : > { %3457 = vrot.lane.b32.xlu0 %v3456_v6, %s3865_s11  ;;  %3467 = vrot.lane.b32.xlu1 %v3456_v6, %s3866_s13  ;;  %vm4124_vm6 = vmpackc.low %vm433_vm5, %vm433_vm5  ;;  %s3873_s13 = smov 96  }
  0x73   : > { %vm4135_vm8 = vmpackc.low %vm418_vm7, %vm418_vm7 }
  0x74   : > { %vm4146_vm10 = vmpackc.low %vm403_vm9, %vm403_vm9 }
  0x75   : > { %vm2900_vm12 = vmpackc.low %vm388_vm11, %vm388_vm11 }
  0x76   : > { %3472 = vrot.lane.b32.xlu0 %v3451_v4, %s3867_s25  ;;  %3477 = vrot.lane.b32.xlu1 %v3456_v6, %s3867_s25 }
  0x7a   : > { %3482 = vrot.lane.b32.xlu0 %v3451_v4, %s3868_s21  ;;  %3487 = vrot.lane.b32.xlu1 %v3456_v6, %s3868_s21 }
  0x7e   : > { %3492 = vrot.lane.b32.xlu0 %v3451_v4, %s3869_s24  ;;  %3497 = vrot.lane.b32.xlu1 %v3456_v6, %s3869_s24 }
  0x82   : > { %3502 = vrot.lane.b32.xlu0 %v3451_v4, %s3871_s18  ;;  %3507 = vrot.lane.b32.xlu1 %v3456_v6, %s3871_s18  ;;  %v3532_v4 = vld [vmem:[#allocation5 + $0xe0] ss:$16 sps:$4 sm:$0xff]   ;;  %v3516_v6 = vld [vmem:[#allocation5 + $0xe8] ss:$16 sps:$4 sm:$0xff]   ;;  %s368_s18 = scalar_lea.vmem [#allocation10], %s2879_s5 }
  0x86   : > { %476 = vperm.xlu0 %3511, %v472_v9   ;;  %481 = vperm.xlu1 %3512, %v473_v10   ;;  %v3536_v9 = vld [vmem:[#allocation5 + $0xc0] ss:$16 sps:$4 sm:$0xff]   ;;  %v3514_v10 = vld [vmem:[#allocation5 + $0xe4] ss:$16 sps:$4 sm:$0xff]  }
  0xe0   : > { %v3453_v14 = vpop.permute.xlu0 %3452  ;;  %v3463_v15 = vpop.permute.xlu1 %3462 }
  0xe1   : > { %v3455_v16 = vunpack.i.h.bf16 %v3453_v14  ;;  %v3454_v17 = vunpack.i.l.bf16 %v3453_v14  ;;  %v3465_v18 = vunpack.i.h.bf16 %v3463_v15  ;;  %v3464_v19 = vunpack.i.l.bf16 %v3463_v15  ;;  %v3540_v14 = vld [vmem:[#allocation5 + $0xa0] ss:$16 sps:$4 sm:$0xff]   ;;  %v3517_v15 = vld [vmem:[#allocation5 + $0xc4] ss:$16 sps:$4 sm:$0xff]  }
  0xe3   : > { %v2886_v21 = vpack.c.bf16 %v3455_v16, %v3454_v17  ;;  %v2889_v22 = vpack.c.bf16 %v3465_v18, %v3464_v19  ;;  %v3522_v16 = vld [vmem:[#allocation5 + $0xa8] ss:$16 sps:$4 sm:$0xff]   ;;  %v3541_v17 = vld [vmem:[#allocation5 + $0x80] ss:$16 sps:$4 sm:$0xff]   ;;  %v3520_v18 = vld [vmem:[#allocation5 + $0xa4] ss:$16 sps:$4 sm:$0xff]  }
  0xe4   : > { %v3458_v23 = vpop.permute.xlu0 %3457  ;;  %v3468_v24 = vpop.permute.xlu1 %3467  ;;  %v3525_v19 = vld [vmem:[#allocation5 + $0x88] ss:$16 sps:$4 sm:$0xff]  }
  0xe5   : > { %v3460_v25 = vunpack.i.h.bf16 %v3458_v23  ;;  %v3459_v26 = vunpack.i.l.bf16 %v3458_v23  ;;  %3139 = vmatpush3.bf16.msk.msra.mxu0 %vm4105_vm2, %v2886_v21  ;;  %v3470_v27 = vunpack.i.h.bf16 %v3468_v24  ;;  %v3469_v28 = vunpack.i.l.bf16 %v3468_v24  ;;  %v3523_v21 = vld [vmem:[#allocation5 + $0x84] ss:$16 sps:$4 sm:$0xff]   ;;  %v3531_v24 = vld [vmem:[#allocation5 + $0x48] ss:$16 sps:$4 sm:$0xff]  }
  0xe6   : > { %3140 = vmatprep.subr.bf16.mxu0 %v3864_v0  ;;  %v3526_v23 = vld [vmem:[#allocation5 + $0x64] ss:$16 sps:$4 sm:$0xff]  }
  0xe7   : > { %v2905_v30 = vpack.c.bf16 %v3460_v25, %v3459_v26  ;;  %v2908_v31 = vpack.c.bf16 %v3470_v27, %v3469_v28  ;;  %v3529_v25 = vld [vmem:[#allocation5 + $0x44] ss:$16 sps:$4 sm:$0xff]   ;;  %v3535_v26 = vld [vmem:[#allocation5 + $0x28] ss:$16 sps:$4 sm:$0xff]  }
  0xe8   : > { %v3473_v32 = vpop.permute.xlu0 %3472  ;;  %v3478_v33 = vpop.permute.xlu1 %3477  ;;  %v3533_v27 = vld [vmem:[#allocation5 + $0x24] ss:$16 sps:$4 sm:$0xff]   ;;  %v3539_v28 = vld [vmem:[#allocation5 + $0x8] ss:$16 sps:$4 sm:$0xff]  }
  0xe9   : > { %v3475_v34 = vunpack.i.h.bf16 %v3473_v32  ;;  %v3474_v35 = vunpack.i.l.bf16 %v3473_v32  ;;  %3141 = vmatpush3.bf16.msk.msra.mxu0 %vm4113_vm4, %v2889_v22  ;;  %3157 = vmatpush3.bf16.msk.msra.mxu1 %vm4105_vm2, %v2905_v30  ;;  %v3480_v36 = vunpack.i.h.bf16 %v3478_v33  ;;  %v3479_v37 = vunpack.i.l.bf16 %v3478_v33  ;;  %v3528_v22 = vld [vmem:[#allocation5 + $0x68] ss:$16 sps:$4 sm:$0xff]   ;;  %v3543_v30 = vld [vmem:[#allocation5 + $0x40] ss:$16 sps:$4 sm:$0xff]  }
  0xea   : > { %3142 = vmatprep.subr.bf16.mxu0 %v3864_v0  ;;  %3158 = vmatprep.subr.bf16.mxu1 %v3864_v0  ;;  %v3545_v32 = vld [vmem:[#allocation5] ss:$16 sps:$4 sm:$0xff]  }
  0xeb   : > { %v2892_v39 = vpack.c.bf16 %v3475_v34, %v3474_v35  ;;  %v2911_v40 = vpack.c.bf16 %v3480_v36, %v3479_v37 }
  0xec   : > { %v3483_v41 = vpop.permute.xlu0 %3482  ;;  %v3488_v42 = vpop.permute.xlu1 %3487 }
  0xed   : > { %v3485_v43 = vunpack.i.h.bf16 %v3483_v41  ;;  %v3484_v44 = vunpack.i.l.bf16 %v3483_v41  ;;  %3143 = vmatpush3.bf16.msk.msra.mxu0 %vm4124_vm6, %v2892_v39  ;;  %3159 = vmatpush3.bf16.msk.msra.mxu1 %vm4113_vm4, %v2908_v31  ;;  %v3490_v45 = vunpack.i.h.bf16 %v3488_v42  ;;  %v3489_v46 = vunpack.i.l.bf16 %v3488_v42  ;;  %v3544_v31 = vld [vmem:[#allocation5 + $0x20] ss:$16 sps:$4 sm:$0xff]  }
  0xee   : > { %3144 = vmatprep.subr.bf16.mxu0 %v3864_v0  ;;  %3160 = vmatprep.subr.bf16.mxu1 %v3864_v0 }
  0xef   : > { %v2895_v48 = vpack.c.bf16 %v3485_v43, %v3484_v44  ;;  %v2914_v49 = vpack.c.bf16 %v3490_v45, %v3489_v46 }
  0xf0   : > { %v3493_v50 = vpop.permute.xlu0 %3492  ;;  %v3498_v51 = vpop.permute.xlu1 %3497 }
  0xf1   : > { %v3495_v52 = vunpack.i.h.bf16 %v3493_v50  ;;  %v3494_v53 = vunpack.i.l.bf16 %v3493_v50  ;;  %3145 = vmatpush3.bf16.msk.msra.mxu0 %vm4135_vm8, %v2895_v48  ;;  %3161 = vmatpush3.bf16.msk.msra.mxu1 %vm4124_vm6, %v2911_v40  ;;  %v3500_v54 = vunpack.i.h.bf16 %v3498_v51  ;;  %v3499_v55 = vunpack.i.l.bf16 %v3498_v51  ;;  %v2948_v48 = vld [vmem:[%s4593_s4 + $0x1] ss:$0 sm:$0xff] }
  0xf2   : > { %3146 = vmatprep.subr.bf16.mxu0 %v3864_v0  ;;  %3162 = vmatprep.subr.bf16.mxu1 %v3864_v0 }
  0xf3   : > { %v2898_v57 = vpack.c.bf16 %v3495_v52, %v3494_v53  ;;  %v2917_v58 = vpack.c.bf16 %v3500_v54, %v3499_v55 }
  0xf4   : > { %v3503_v59 = vpop.permute.xlu0 %3502  ;;  %v3508_v60 = vpop.permute.xlu1 %3507 }
  0xf5   : > { %v3505_v61 = vunpack.i.h.bf16 %v3503_v59  ;;  %v3504_v62 = vunpack.i.l.bf16 %v3503_v59  ;;  %3147 = vmatpush3.bf16.msk.msra.mxu0 %vm4146_vm10, %v2898_v57  ;;  %3163 = vmatpush3.bf16.msk.msra.mxu1 %vm4135_vm8, %v2914_v49  ;;  %v3510_v63 = vunpack.i.h.bf16 %v3508_v60  ;;  %v3509_v1 = vunpack.i.l.bf16 %v3508_v60  ;;  %v2923_v57 = vld [vmem:[%s4593_s4] ss:$0 sm:$0xff] }
  0xf6   : > { %3148 = vmatprep.subr.bf16.mxu0 %v3864_v0  ;;  %3164 = vmatprep.subr.bf16.mxu1 %v3864_v0 }
  0xf7   : > { %v2901_v2 = vpack.c.bf16 %v3505_v61, %v3504_v62  ;;  %v2920_v3 = vpack.c.bf16 %v3510_v63, %v3509_v1  ;;  %v4207_v61 = vld [vmem:[%s4593_s4 + $0x2] ss:$0 sm:$0xff] }
  0xf9   : > { %3149 = vmatpush3.bf16.msk.msra.mxu0 %vm2900_vm12, %v2901_v2  ;;  %3165 = vmatpush3.bf16.msk.msra.mxu1 %vm4146_vm10, %v2917_v58 }
  0xfa   : > { %3150 = vmatprep.subr.bf16.mxu0 %v3864_v0  ;;  %3166 = vmatprep.subr.bf16.mxu1 %v3864_v0 }
  0xfd   : > { %3151 = vmatpush3.bf16.msra.mxu0 %v4085_v7  ;;  %3167 = vmatpush3.bf16.msk.msra.mxu1 %vm2900_vm12, %v2920_v3 }
  0xfe   : > { %3168 = vmatprep.subr.bf16.mxu1 %v3864_v0  ;;  %3174 = vmatprep.subr.bf16.mxu0 %v3532_v4 }
 0x100   : > { %3153 = vmatmul.mubr.msk.bf16.vlgmr.msra.gmra.mxu0 %vm489_vm13, %v3513_v5 }
 0x101   : > { %3169 = vmatpush3.bf16.msra.mxu1 %v4089_v8  ;;  %3175 = vmatpush3.bf16.msra.mxu0 %v3532_v4  ;;  %v482_v35 = vpop.permute.xlu1 %481 }
 0x102   : > { %791 = vmatprep.subr.bf16.mxu1 %v3516_v6  ;;  %3176 = vmatprep.subr.bf16.mxu0 %v3536_v9 }
 0x104   : > { %3171 = vmatmul.mubr.msk.bf16.vlgmr.msra.gmra.mxu1 %vm489_vm13, %v3513_v5 }
 0x105   : > { %792 = vmatpush1.bf16.msra.mxu1 %v3514_v10  ;;  %3177 = vmatpush3.bf16.msra.mxu0 %v3536_v9 }
 0x106   : > { %793 = vmatprep.subr.bf16.mxu1 %v3519_v13  ;;  %3178 = vmatprep.subr.bf16.mxu0 %v3540_v14 }
 0x107   : > { %823 = vmatprep.mubr.bf16.mxu1 %v3872_v11 }
 0x109   : > { %794 = vmatpush1.bf16.msra.mxu1 %v3517_v15  ;;  %3179 = vmatpush3.bf16.msra.mxu0 %v3540_v14 }
 0x10a   : > { %795 = vmatprep.subr.bf16.mxu1 %v3522_v16  ;;  %3180 = vmatprep.subr.bf16.mxu0 %v3541_v17 }
 0x10d   : > { %796 = vmatpush1.bf16.msra.mxu1 %v3520_v18  ;;  %3181 = vmatpush3.bf16.msra.mxu0 %v3541_v17 }
 0x10e   : > { %797 = vmatprep.subr.bf16.mxu1 %v3525_v19  ;;  %3182 = vmatprep.subr.bf16.mxu0 %v3542_v20 }
 0x111   : > { %798 = vmatpush1.bf16.msra.mxu1 %v3523_v21  ;;  %3183 = vmatpush3.bf16.msra.mxu0 %v3542_v20 }
 0x112   : > { %799 = vmatprep.subr.bf16.mxu1 %v3528_v22  ;;  %3184 = vmatprep.subr.bf16.mxu0 %v3543_v30 }
 0x115   : > { %800 = vmatpush1.bf16.msra.mxu1 %v3526_v23  ;;  %3185 = vmatpush3.bf16.msra.mxu0 %v3543_v30 }
 0x116   : > { %801 = vmatprep.subr.bf16.mxu1 %v3531_v24  ;;  %3186 = vmatprep.subr.bf16.mxu0 %v3544_v31 }
 0x119   : > { %802 = vmatpush1.bf16.msra.mxu1 %v3529_v25  ;;  %3187 = vmatpush3.bf16.msra.mxu0 %v3544_v31 }
 0x11a   : > { %803 = vmatprep.subr.bf16.mxu1 %v3535_v26  ;;  %3188 = vmatprep.subr.bf16.mxu0 %v3545_v32 }
 0x11d   : > { %804 = vmatpush1.bf16.msra.mxu1 %v3533_v27  ;;  %3189 = vmatpush3.bf16.msra.mxu0 %v3545_v32 }
 0x11e   : > { %805 = vmatprep.subr.bf16.mxu1 %v3539_v28  ;;  %3194 = vmatprep.subr.bf16.mxu0 %v3864_v0 }
 0x121   : > { %806 = vmatpush1.bf16.msra.mxu1 %v3537_v29 }
 0x122   : > { %3206 = vmatprep.subr.bf16.mxu1 %v3864_v0 }
 0x124   : > { %824 = vmatmul.mubr.bf16.vlgmr.msra.gmra.mxu1 %v4085_v7  ;;  %v477_v7 = vpop.permute.xlu0 %476 }
 0x125   : > { %833 = vmatprep.mubr.bf16.mxu1 %v3872_v11 }
 0x12c   : > { %834 = vmatmul.mubr.bf16.gmra.mxu1 %v4089_v8 }
 0x12d   : > { %3208 = vmatprep.mubr.msk.bf16.mxu1 %vm3870_vm0, %v3864_v0 }
 0x1c0   : > { %v527_v33 = vpop.f32.mrf.mxu0 }
 0x1c1   : > { %v4175_v36 = vadd.f32 %v527_v33, %v477_v7 }
 0x1c2   : > { %v3154_v34 = vpop.f32.mrf.mxu0 }
 0x1c4   : > { %v530_v8 = vpop.f32.mrf.mxu0  ;;  %v568_v37 = vpop.f32.mrf.mxu1 }
 0x1c5   : > { %v4177_v38 = vadd.f32 %v530_v8, %v482_v35  ;;  %v4181_v43 = vadd.f32 %v568_v37, %v477_v7 }
 0x1c6   : > { %v3155_v39 = vpop.f32.mrf.mxu0  ;;  %v3172_v40 = vpop.f32.mrf.mxu1 }
 0x1c7   : > { %v575_v41 = vpack.c.bf16 %v4177_v38, %v4175_v36 }
 0x1c8   : > { %v571_v42 = vpop.f32.mrf.mxu1 }
 0x1c9   : > { %v4183_v44 = vadd.f32 %v571_v42, %v482_v35  ;;  %3190 = vmatprep.mubr.bf16.mxu0 %v575_v41 }
 0x1ca   : > { %v3173_v45 = vpop.f32.mrf.mxu1 }
 0x1cb   : > { %v576_v46 = vpack.c.bf16 %v4183_v44, %v4181_v43 }
 0x1cd   : > { %3191 = vmatmul.mubr.bf16.vlgmr.msra.gmra.mxu0 %v576_v46 }
 0x1ce   : > { %3196 = vmatprep.mubr.msk.bf16.mxu0 %vm3870_vm0, %v3864_v0 }
 0x1e4   : > { %v825_v47 = vpop.f32.mrf.mxu1 }
 0x1e5   : > { %v849_v50 = vadd.f32 %v2948_v48, %v825_v47 }
 0x1e6   : > { %v827_v49 = vpop.f32.mrf.mxu1 }
 0x1e7   : > { %v858_v2 = vadd.f32 %v4207_v61, %v827_v49 }
 0x1e8   : > { %v829_v51 = vpop.f32.mrf.mxu1 }
 0x1e9   : > { %v850_v52 = vadd.f32 %v2948_v48, %v829_v51 }
 0x1ea   : > { %v831_v62 = vpop.f32.mrf.mxu1 }
 0x1eb   : > { %v4192_v53 = vpack.c.bf16 %v850_v52, %v849_v50  ;;  %v859_v3 = vadd.f32 %v4207_v61, %v831_v62 }
 0x1ec   : > { %v835_v14 = vpop.f32.mrf.mxu1 }
 0x1ed   : > { %995 = vrot.lane.b32.xlu1 %v4192_v53, %s3873_s13  ;;  %v873_v54 = vsel %vm868_vm14, %v4192_v53, 0  ;;  %v4215_v13 = vpack.c.bf16 %v859_v3, %v858_v2  ;;  %v851_v16 = vadd.f32 %v2948_v48, %v835_v14 }
 0x1ee   : > { %3195 = vmatpush3.bf16.xpose.msra.mxu0 %v873_v54  ;;  %v4225_v15 = vpop.f32.mrf.mxu1 }
 0x1ef   : > { %3200 = vmatprep.subr.bf16.mxu0 %v3864_v0 }
 0x1f0   : > { %v839_v17 = vpop.f32.mrf.mxu1 }
 0x1f1   : > { %v852_v18 = vadd.f32 %v2948_v48, %v839_v17 }
 0x1f2   : > { %v4234_v29 = vpop.f32.mrf.mxu1 }
 0x1f3   : > { %v4227_v19 = vpack.c.bf16 %v852_v18, %v851_v16 }
 0x25f   : > { %v996_v55 = vpop.permute.xlu1 %995 }
 0x260   : > { %v1001_v56 = vsel %vm868_vm14, %v996_v55, 0 }
 0x261   : > { %3207 = vmatpush3.bf16.xpose.msra.mxu1 %v1001_v56 }
 0x262   : > { %3218 = vmatprep.subr.bf16.mxu1 %v3864_v0 }
 0x28d   : > { %v3192_v58 = vpop.f32.mrf.mxu0 }
 0x28e   : > { %v689_v59 = vadd.f32 %v3192_v58, %v2923_v57 }
 0x28f   : > { %v680_v60 = vpop.f32.mrf.mxu0 }
 0x290   : > { %v681_v5 = vadd.f32 %v2923_v57, %v680_v60 }
 0x291   : > { %v3193_v63 = vpop.f32.mrf.mxu0 }
 0x292   : > { %v692_v1 = vadd.f32 %v3193_v63, %v2923_v57 }
 0x293   : > { %v683_v4 = vpop.f32.mrf.mxu0 }
 0x294   : > { %v4211_v6 = vpack.c.bf16 %v692_v1, %v689_v59  ;;  %v684_v9 = vadd.f32 %v2923_v57, %v683_v4 }
 0x296   : > { %v4213_v10 = vpack.c.bf16 %v684_v9, %v681_v5  ;;  %v4251_v9 = vld [vmem:[#allocation5 + $0x6c] ss:$16 sps:$4 sm:$0xff]  }
 0x298   : > { %992 = vrot.lane.b32.xlu0 %v4213_v10, %s3873_s13  ;;  %3197 = vmatmul.mubr.msk.bf16.vlgmr.msra.gmra.mxu0 %vm868_vm14, %v4213_v10 }
 0x299   : > { %3201 = vmatpush3.bf16.msra.mxu0 %v4215_v13  ;;  %3202 = vmatprep.mubr.msk.bf16.mxu0 %vm3870_vm0, %v3864_v0 }
 0x29a   : > { %3212 = vmatprep.subr.bf16.mxu0 %v3864_v0 }
 0x30a   : > { %v993_v20 = vpop.permute.xlu0 %992 }
 0x30b   : > { %3209 = vmatmul.mubr.msk.bf16.vlgmr.msra.gmra.mxu1 %vm868_vm14, %v993_v20 }
 0x30c   : > { %3222 = vmatprep.mubr.msk.bf16.mxu1 %vm3870_vm0, %v3864_v0  ;;  %3219 = vmatpush3.bf16.msra.mxu1 %v4251_v9 }
 0x30d   : > { %3220 = vmatprep.subr.bf16.mxu1 %v3864_v0 }
 0x358   : > { %v909_v21 = vpop.f32.mrf.mxu0 }
 0x359   : > { %v916_v22 = vmul.f32 0.17677669, %v909_v21 }
 0x35a   : > { %v3198_v23 = vpop.f32.mrf.mxu0 }
 0x35b   : > { %v919_v24 = vsel %vm918_vm15, %v916_v22, -inf  ;;  %v4256_v23 = vld [vmem:[#allocation5 + $0x2c] ss:$16 sps:$4 sm:$0xff]  }
 0x35c   : > { %920 = vmax.xlane.f32.xlu1 %v919_v24  ;;  %v912_v25 = vpop.f32.mrf.mxu0 }
 0x35d   : > { %v917_v26 = vmul.f32 0.17677669, %v912_v25  ;;  %v4260_v25 = vld [vmem:[#allocation5 + $0xc] ss:$16 sps:$4 sm:$0xff]  }
 0x35e   : > { %v3199_v27 = vpop.f32.mrf.mxu0 }
 0x35f   : > { %v922_v28 = vsel %vm918_vm15, %v917_v26, -inf }
 0x360   : > { %923 = vmax.xlane.f32.xlu0 %v922_v28 }
 0x3cb   : > { %v1037_v30 = vpop.f32.mrf.mxu1 }
 0x3cc   : > { %v1044_v31 = vmul.f32 0.17677669, %v1037_v30 }
 0x3cd   : > { %v3210_v32 = vpop.f32.mrf.mxu1 }
 0x3ce   : > { %v1046_v33 = vsel %vm918_vm15, %v1044_v31, -inf }
 0x3cf   : > { %v1040_v7 = vpop.f32.mrf.mxu1  ;;  %1047 = vmax.xlane.f32.xlu0 %v1046_v33 }
 0x3d0   : > { %v1045_v34 = vmul.f32 0.17677669, %v1040_v7 }
 0x3d1   : > { %v3211_v35 = vpop.f32.mrf.mxu1 }
 0x3d2   : > { %v1049_v8 = vsel %vm918_vm15, %v1045_v34, -inf }
 0x3d3   : > { %1050 = vmax.xlane.f32.xlu1 %v1049_v8 }
 0x3e5   : > { %v921_v37 = vpop.xlane.xlu1 %920 }
 0x3e6   : > { %v925_v39 = vsub.f32 %v916_v22, %v921_v37 }
 0x3e8   : > { %v927_v40 = vmul.f32 1.442695, %v925_v39 }
 0x3e9   : > { %v924_v41 = vpop.xlane.xlu0 %923 }
 0x3ea   : > { %3594 = vpow2.f32 %v927_v40  ;;  %v926_v42 = vsub.f32 %v917_v26, %v924_v41  ;;  %v4267_v26 = vld [vmem:[#allocation5 + $0x4c] ss:$16 sps:$4 sm:$0xff]  }
 0x3eb   : > { %3221 = vmatpush3.bf16.msra.mxu1 %v4267_v26 }
 0x3ec   : > { %v929_v45 = vmul.f32 1.442695, %v926_v42  ;;  %3234 = vmatprep.subr.bf16.mxu1 %v3864_v0 }
 0x3ee   : > { %3596 = vpow2.f32 %v929_v45 }
 0x3f7   : > { %v3595_v46 = vpop.eup %3594 }
 0x3f8   : > { %v931_v47 = vsel %vm918_vm15, %v3595_v46, 0.0 }
 0x3f9   : > { %932 = vadd.xlane.f32.xlu0 %v931_v47 }
 0x3fb   : > { %v3597_v48 = vpop.eup %3596 }
 0x3fc   : > { %v934_v49 = vsel %vm918_vm15, %v3597_v48, 0.0 }
 0x3fd   : > { %935 = vadd.xlane.f32.xlu1 %v934_v49 }
 0x458   : > { %v1048_v50 = vpop.xlane.xlu0 %1047 }
 0x459   : > { %v1052_v51 = vsub.f32 %v1044_v31, %v1048_v50 }
 0x45b   : > { %v1054_v52 = vmul.f32 1.442695, %v1052_v51 }
 0x45c   : > { %v1051_v54 = vpop.xlane.xlu1 %1050 }
 0x45d   : > { %3598 = vpow2.f32 %v1054_v52  ;;  %v1053_v55 = vsub.f32 %v1045_v34, %v1051_v54 }
 0x45f   : > { %v1056_v56 = vmul.f32 1.442695, %v1053_v55 }
 0x461   : > { %3600 = vpow2.f32 %v1056_v56 }
 0x46a   : > { %v3599_v57 = vpop.eup %3598 }
 0x46b   : > { %v1058_v58 = vsel %vm918_vm15, %v3599_v57, 0.0 }
 0x46c   : > { %1059 = vadd.xlane.f32.xlu0 %v1058_v58 }
 0x46e   : > { %v3601_v59 = vpop.eup %3600 }
 0x46f   : > { %v1061_v60 = vsel %vm918_vm15, %v3601_v59, 0.0 }
 0x470   : > { %1062 = vadd.xlane.f32.xlu1 %v1061_v60 }
 0x481   : > { %1236 = vrot.lane.b32.xlu1 %v4192_v53, %s3874_s22 }
 0x482   : > { %1070 = vrot.lane.b32.xlu0 %v4215_v13, %s3873_s13  ;;  %v933_v62 = vpop.xlane.xlu0 %932 }
 0x483   : > { %3602 = vrcp.f32 %v933_v62 }
 0x485   : > { %1234 = vrot.lane.b32.xlu1 %v4213_v10, %s3874_s22 }
 0x486   : > { %v936_v63 = vpop.xlane.xlu1 %935 }
 0x487   : > { %3604 = vrcp.f32 %v936_v63 }
 0x490   : > { %v3603_v1 = vpop.eup %3602 }
 0x491   : > { %v939_v3 = vmul.f32 %v3603_v1, %v3595_v46 }
 0x494   : > { %v3605_v2 = vpop.eup %3604 }
 0x495   : > { %v940_v4 = vmul.f32 %v3605_v2, %v3597_v48 }
 0x497   : > { %v941_v5 = vpack.c.bf16 %v940_v4, %v939_v3 }
 0x499   : > { %3203 = vmatmul.mubr.msk.bf16.vlgmr.msra.gmra.mxu0 %vm918_vm15, %v941_v5 }
 0x49a   : > { %3214 = vmatprep.mubr.msk.bf16.mxu0 %vm3870_vm0, %v3864_v0 }
 0x4f5   : > { %v1060_v14 = vpop.xlane.xlu0 %1059 }
 0x4f6   : > { %3606 = vrcp.f32 %v1060_v14 }
 0x4f9   : > { %v1063_v16 = vpop.xlane.xlu1 %1062  ;;  %v1071_v17 = vpop.permute.xlu0 %1070 }
 0x4fa   : > { %3608 = vrcp.f32 %v1063_v16  ;;  %3213 = vmatpush3.bf16.msra.mxu0 %v1071_v17 }
 0x4fb   : > { %3226 = vmatprep.subr.bf16.mxu0 %v3864_v0 }
 0x4fd   : > { %v1237_v34 = vpop.permute.xlu1 %1236 }
 0x4fe   : > { %v1242_v39 = vsel %vm868_vm14, %v1237_v34, 0 }
 0x501   : > { %v1235_v40 = vpop.permute.xlu1 %1234 }
 0x503   : > { %v3607_v18 = vpop.eup %3606 }
 0x504   : > { %v1066_v21 = vmul.f32 %v3607_v18, %v3599_v57 }
 0x507   : > { %v3609_v20 = vpop.eup %3608 }
 0x508   : > { %v1067_v22 = vmul.f32 %v3609_v20, %v3601_v59 }
 0x50a   : > { %v1068_v24 = vpack.c.bf16 %v1067_v22, %v1066_v21 }
 0x50c   : > { %3215 = vmatmul.mubr.msk.bf16.vlgmr.msra.gmra.mxu0 %vm918_vm15, %v1068_v24 }
 0x50d   : > { %3227 = vmatpush3.bf16.msra.mxu0 %v4256_v23  ;;  %3230 = vmatprep.mubr.msk.bf16.mxu0 %vm3870_vm0, %v3864_v0 }
 0x50e   : > { %3228 = vmatprep.subr.bf16.mxu0 %v3864_v0 }
 0x511   : > { %3229 = vmatpush3.bf16.msra.mxu0 %v4260_v25 }
 0x512   : > { %3240 = vmatprep.subr.bf16.mxu0 %v3864_v0 }
 0x559   : > { %v979_v27 = vpop.f32.mrf.mxu0 }
 0x55b   : > { %v3204_v28 = vpop.f32.mrf.mxu0 }
 0x55d   : > { %v982_v30 = vpop.f32.mrf.mxu0 }
 0x55e   : > { %v986_v31 = vpack.c.bf16 %v982_v30, %v979_v27 }
 0x55f   : > { %v3205_v32 = vpop.f32.mrf.mxu0 }
 0x560   : > { %3231 = vmatmul.mubr.msk.bf16.vlgmr.msra.gmra.mxu0 %vm868_vm14, %v986_v31  ;;  %v4309_v31 = vld [vmem:[#allocation5 + $0xac] ss:$16 sps:$4 sm:$0xff]  }
 0x561   : > { %3242 = vmatprep.mubr.msk.bf16.mxu0 %vm3870_vm0, %v3864_v0  ;;  %v4313_v32 = vld [vmem:[#allocation5 + $0x8c] ss:$16 sps:$4 sm:$0xff]  }
 0x5cc   : > { %v1110_v33 = vpop.f32.mrf.mxu0 }
 0x5ce   : > { %v3216_v7 = vpop.f32.mrf.mxu0 }
 0x5d0   : > { %v1113_v35 = vpop.f32.mrf.mxu0 }
 0x5d1   : > { %v1117_v8 = vpack.c.bf16 %v1113_v35, %v1110_v33 }
 0x5d2   : > { %v3217_v37 = vpop.f32.mrf.mxu0 }
 0x5d3   : > { %3223 = vmatmul.mubr.msk.bf16.vlgmr.msra.gmra.mxu1 %vm868_vm14, %v1117_v8 }
 0x5d4   : > { %3235 = vmatpush3.bf16.xpose.msra.mxu1 %v1242_v39  ;;  %3236 = vmatprep.mubr.msk.bf16.mxu1 %vm3870_vm0, %v3864_v0 }
 0x5d5   : > { %3246 = vmatprep.subr.bf16.mxu1 %v3864_v0 }
 0x5db   : > { %3237 = vmatmul.mubr.msk.bf16.vlgmr.msra.gmra.mxu1 %vm868_vm14, %v1235_v40 }
 0x5dc   : > { %3250 = vmatprep.mubr.msk.bf16.mxu1 %vm3870_vm0, %v3864_v0  ;;  %3247 = vmatpush3.bf16.msra.mxu1 %v4309_v31 }
 0x5dd   : > { %3248 = vmatprep.subr.bf16.mxu1 %v3864_v0 }
 0x5e0   : > { %3249 = vmatpush3.bf16.msra.mxu1 %v4313_v32 }
 0x5e1   : > { %3260 = vmatprep.subr.bf16.mxu1 %v3864_v0 }
 0x620   : > { %v4282_v41 = vpop.f32.mrf.mxu0 }
 0x622   : > { %v3232_v42 = vpop.f32.mrf.mxu0 }
 0x624   : > { %v4284_v45 = vpop.f32.mrf.mxu0 }
 0x626   : > { %v3233_v46 = vpop.f32.mrf.mxu0 }
 0x693   : > { %v4286_v47 = vpop.f32.mrf.mxu1 }
 0x695   : > { %v3224_v48 = vpop.f32.mrf.mxu1 }
 0x697   : > { %v4288_v49 = vpop.f32.mrf.mxu1 }
 0x699   : > { %v3225_v50 = vpop.f32.mrf.mxu1 }
 0x69b   : > { %v1278_v51 = vpop.f32.mrf.mxu1 }
 0x69c   : > { %v1285_v52 = vmul.f32 0.17677669, %v1278_v51 }
 0x69d   : > { %v3238_v54 = vpop.f32.mrf.mxu1 }
 0x69e   : > { %v1287_v55 = vsel %vm918_vm15, %v1285_v52, -inf }
 0x69f   : > { %1288 = vmax.xlane.f32.xlu0 %v1287_v55  ;;  %v1281_v56 = vpop.f32.mrf.mxu1 }
 0x6a0   : > { %v1286_v57 = vmul.f32 0.17677669, %v1281_v56 }
 0x6a1   : > { %v3239_v58 = vpop.f32.mrf.mxu1 }
 0x6a2   : > { %v1290_v59 = vsel %vm918_vm15, %v1286_v57, -inf }
 0x6a3   : > { %1291 = vmax.xlane.f32.xlu1 %v1290_v59 }
 0x6b4   : > { %1310 = vrot.lane.b32.xlu1 %v4215_v13, %s3874_s22 }
 0x6b8   : > { %1420 = vrot.lane.b32.xlu1 %v4213_v10, %s3875_s16 }
 0x728   : > { %v1289_v60 = vpop.xlane.xlu0 %1288 }
 0x729   : > { %v1293_v62 = vsub.f32 %v1285_v52, %v1289_v60 }
 0x72b   : > { %v1295_v63 = vmul.f32 1.442695, %v1293_v62 }
 0x72c   : > { %v1292_v1 = vpop.xlane.xlu1 %1291 }
 0x72d   : > { %3610 = vpow2.f32 %v1295_v63  ;;  %v1294_v2 = vsub.f32 %v1286_v57, %v1292_v1  ;;  %v1228_v1 = vadd.f32 %v4282_v41, %v4286_v47 }
 0x72f   : > { %v1297_v3 = vmul.f32 1.442695, %v1294_v2 }
 0x730   : > { %v1311_v4 = vpop.permute.xlu1 %1310 }
 0x731   : > { %3612 = vpow2.f32 %v1297_v3  ;;  %3241 = vmatpush3.bf16.msra.mxu0 %v1311_v4 }
 0x732   : > { %3254 = vmatprep.subr.bf16.mxu0 %v3864_v0 }
 0x73a   : > { %v3611_v5 = vpop.eup %3610 }
 0x73b   : > { %v1299_v14 = vsel %vm918_vm15, %v3611_v5, 0.0 }
 0x73c   : > { %1300 = vadd.xlane.f32.xlu0 %v1299_v14 }
 0x73e   : > { %v3613_v16 = vpop.eup %3612 }
 0x73f   : > { %v1302_v17 = vsel %vm918_vm15, %v3613_v16, 0.0 }
 0x740   : > { %1303 = vadd.xlane.f32.xlu0 %v1302_v17 }
 0x756   : > { %1422 = vrot.lane.b32.xlu0 %v4192_v53, %s3875_s16  ;;  %v1421_v53 = vpop.permute.xlu1 %1420 }
 0x7c5   : > { %v1301_v10 = vpop.xlane.xlu0 %1300 }
 0x7c6   : > { %3614 = vrcp.f32 %v1301_v10  ;;  %v4338_v10 = vld [vmem:[#allocation5 + $0xec] ss:$16 sps:$4 sm:$0xff]  }
 0x7c9   : > { %v1304_v18 = vpop.xlane.xlu0 %1303 }
 0x7ca   : > { %3616 = vrcp.f32 %v1304_v18 }
 0x7cd   : > { %v1423_v27 = vpop.permute.xlu0 %1422 }
 0x7ce   : > { %v1428_v30 = vsel %vm868_vm14, %v1423_v27, 0 }
 0x7d3   : > { %v3615_v20 = vpop.eup %3614 }
 0x7d4   : > { %v1307_v22 = vmul.f32 %v3615_v20, %v3611_v5  ;;  %v1231_v5 = vadd.f32 %v4284_v45, %v4288_v49 }
 0x7d7   : > { %v3617_v21 = vpop.eup %3616 }
 0x7d8   : > { %v1308_v24 = vmul.f32 %v3617_v21, %v3613_v16 }
 0x7da   : > { %v1309_v28 = vpack.c.bf16 %v1308_v24, %v1307_v22  ;;  %v1610_v22 = vsel %vm868_vm14, %v4227_v19, 0 }
 0x7dc   : > { %3243 = vmatmul.mubr.msk.bf16.vlgmr.msra.gmra.mxu0 %vm918_vm15, %v1309_v28 }
 0x7dd   : > { %3255 = vmatpush3.bf16.xpose.msra.mxu0 %v1428_v30  ;;  %3256 = vmatprep.mubr.msk.bf16.mxu0 %vm3870_vm0, %v3864_v0  ;;  %v4362_v30 = vld [vmem:[#allocation5 + $0xcc] ss:$16 sps:$4 sm:$0xff]  }
 0x7de   : > { %3266 = vmatprep.subr.bf16.mxu0 %v3864_v0 }
 0x7e4   : > { %3257 = vmatmul.mubr.msk.bf16.vlgmr.msra.gmra.mxu0 %vm868_vm14, %v1421_v53 }
 0x7e5   : > { %3270 = vmatprep.mubr.msk.bf16.mxu0 %vm3870_vm0, %v3864_v0  ;;  %3267 = vmatpush3.bf16.msra.mxu0 %v4338_v10 }
 0x7e6   : > { %3268 = vmatprep.subr.bf16.mxu0 %v3864_v0 }
 0x7e9   : > { %3269 = vmatpush3.bf16.msra.mxu0 %v4362_v30 }
 0x7ea   : > { %3280 = vmatprep.subr.bf16.mxu0 %v3864_v0 }
 0x89c   : > { %v1350_v33 = vpop.f32.mrf.mxu0 }
 0x89e   : > { %v3244_v7 = vpop.f32.mrf.mxu0 }
 0x8a0   : > { %v1353_v34 = vpop.f32.mrf.mxu0 }
 0x8a1   : > { %v1357_v35 = vpack.c.bf16 %v1353_v34, %v1350_v33  ;;  %v860_v33 = vadd.f32 %v4207_v61, %v4225_v15 }
 0x8a2   : > { %v3245_v8 = vpop.f32.mrf.mxu0 }
 0x8a3   : > { %3251 = vmatmul.mubr.msk.bf16.vlgmr.msra.gmra.mxu1 %vm868_vm14, %v1357_v35 }
 0x8a4   : > { %v1464_v37 = vpop.f32.mrf.mxu0  ;;  %3262 = vmatprep.mubr.msk.bf16.mxu1 %vm3870_vm0, %v3864_v0 }
 0x8a5   : > { %v1471_v39 = vmul.f32 0.17677669, %v1464_v37 }
 0x8a6   : > { %v3258_v40 = vpop.f32.mrf.mxu0 }
 0x8a7   : > { %v1473_v42 = vsel %vm918_vm15, %v1471_v39, -inf }
 0x8a8   : > { %1474 = vmax.xlane.f32.xlu1 %v1473_v42  ;;  %v1467_v46 = vpop.f32.mrf.mxu0 }
 0x8a9   : > { %v1472_v48 = vmul.f32 0.17677669, %v1467_v46 }
 0x8aa   : > { %v3259_v50 = vpop.f32.mrf.mxu0 }
 0x8ab   : > { %v1476_v51 = vsel %vm918_vm15, %v1472_v48, -inf }
 0x8ac   : > { %1477 = vmax.xlane.f32.xlu0 %v1476_v51 }
 0x931   : > { %v1475_v52 = vpop.xlane.xlu1 %1474 }
 0x932   : > { %v1479_v54 = vsub.f32 %v1471_v39, %v1475_v52 }
 0x934   : > { %v1481_v55 = vmul.f32 1.442695, %v1479_v54 }
 0x935   : > { %v1478_v56 = vpop.xlane.xlu0 %1477 }
 0x936   : > { %3618 = vpow2.f32 %v1481_v55  ;;  %v1480_v57 = vsub.f32 %v1472_v48, %v1478_v56 }
 0x938   : > { %v1483_v58 = vmul.f32 1.442695, %v1480_v57 }
 0x93a   : > { %3620 = vpow2.f32 %v1483_v58 }
 0x943   : > { %v3619_v59 = vpop.eup %3618 }
 0x944   : > { %v1485_v60 = vsel %vm918_vm15, %v3619_v59, 0.0 }
 0x945   : > { %1486 = vadd.xlane.f32.xlu0 %v1485_v60 }
 0x947   : > { %v3621_v62 = vpop.eup %3620 }
 0x948   : > { %v1488_v63 = vsel %vm918_vm15, %v3621_v62, 0.0 }
 0x949   : > { %1489 = vadd.xlane.f32.xlu1 %v1488_v63 }
 0x95a   : > { %1727 = vrot.lane.b32.xlu1 %v4227_v19, %s3873_s13 }
 0x95b   : > { %1496 = vrot.lane.b32.xlu0 %v4215_v13, %s3875_s16 }
 0x95e   : > { %1724 = vrot.lane.b32.xlu1 %v4211_v6, %s3873_s13 }
 0x963   : > { %v1411_v2 = vpop.f32.mrf.mxu1 }
 0x964   : > { %v4332_v3 = vadd.f32 %v1411_v2, %v1228_v1 }
 0x965   : > { %v3252_v4 = vpop.f32.mrf.mxu1 }
 0x967   : > { %v1414_v14 = vpop.f32.mrf.mxu1 }
 0x968   : > { %v4336_v16 = vadd.f32 %v1414_v14, %v1231_v5 }
 0x969   : > { %v3253_v17 = vpop.f32.mrf.mxu1 }
 0x9ce   : > { %v1487_v13 = vpop.xlane.xlu0 %1486 }
 0x9cf   : > { %3622 = vrcp.f32 %v1487_v13 }
 0x9d2   : > { %v1490_v41 = vpop.xlane.xlu1 %1489  ;;  %v1497_v47 = vpop.permute.xlu0 %1496 }
 0x9d3   : > { %3624 = vrcp.f32 %v1490_v41  ;;  %3261 = vmatpush3.bf16.msra.mxu1 %v1497_v47 }
 0x9d4   : > { %3274 = vmatprep.subr.bf16.mxu1 %v3864_v0 }
 0x9d6   : > { %v1728_v24 = vpop.permute.xlu1 %1727 }
 0x9d7   : > { %v1733_v27 = vsel %vm868_vm14, %v1728_v24, 0 }
 0x9da   : > { %v1725_v28 = vpop.permute.xlu1 %1724 }
 0x9dc   : > { %v3623_v18 = vpop.eup %3622 }
 0x9dd   : > { %v1493_v49 = vmul.f32 %v3623_v18, %v3619_v59 }
 0x9e0   : > { %v3625_v45 = vpop.eup %3624 }
 0x9e1   : > { %v1494_v20 = vmul.f32 %v3625_v45, %v3621_v62 }
 0x9e3   : > { %v1495_v21 = vpack.c.bf16 %v1494_v20, %v1493_v49 }
 0x9e5   : > { %3263 = vmatmul.mubr.msk.bf16.vlgmr.msra.gmra.mxu1 %vm918_vm15, %v1495_v21 }
 0x9e6   : > { %3275 = vmatpush3.bf16.xpose.msra.mxu1 %v1610_v22  ;;  %3276 = vmatprep.mubr.msk.bf16.mxu1 %vm3870_vm0, %v3864_v0 }
 0x9e7   : > { %3286 = vmatprep.subr.bf16.mxu1 %v3864_v0 }
 0x9ed   : > { %3277 = vmatmul.mubr.msk.bf16.vlgmr.msra.gmra.mxu1 %vm868_vm14, %v4211_v6 }
 0x9ee   : > { %3287 = vmatpush3.bf16.xpose.msra.mxu1 %v1733_v27  ;;  %3288 = vmatprep.mubr.msk.bf16.mxu1 %vm3870_vm0, %v3864_v0 }
 0x9ef   : > { %3298 = vmatprep.subr.bf16.mxu1 %v3864_v0 }
 0x9f5   : > { %3289 = vmatmul.mubr.msk.bf16.vlgmr.msra.gmra.mxu1 %vm868_vm14, %v1725_v28 }
 0x9f6   : > { %3299 = vmatpush3.bf16.msra.mxu1 %v4251_v9  ;;  %3302 = vmatprep.mubr.msk.bf16.mxu1 %vm3870_vm0, %v3864_v0  ;;  %v861_v9 = vadd.f32 %v4207_v61, %v4234_v29 }
 0x9f7   : > { %3300 = vmatprep.subr.bf16.mxu1 %v3864_v0 }
 0x9f8   : > { %v4370_v8 = vpack.c.bf16 %v861_v9, %v860_v33 }
 0x9fa   : > { %3301 = vmatpush3.bf16.msra.mxu1 %v4267_v26 }
 0x9fb   : > { %3314 = vmatprep.subr.bf16.mxu1 %v3864_v0 }
 0xaa5   : > { %v1536_v53 = vpop.f32.mrf.mxu1 }
 0xaa7   : > { %v3264_v7 = vpop.f32.mrf.mxu1 }
 0xaa9   : > { %v1539_v34 = vpop.f32.mrf.mxu1 }
 0xaaa   : > { %v1543_v35 = vpack.c.bf16 %v1539_v34, %v1536_v53 }
 0xaab   : > { %v3265_v26 = vpop.f32.mrf.mxu1 }
 0xaac   : > { %3271 = vmatmul.mubr.msk.bf16.vlgmr.msra.gmra.mxu0 %vm868_vm14, %v1543_v35 }
 0xaad   : > { %3281 = vmatpush3.bf16.msra.mxu0 %v4370_v8  ;;  %v1646_v37 = vpop.f32.mrf.mxu1  ;;  %3282 = vmatprep.mubr.msk.bf16.mxu0 %vm3870_vm0, %v3864_v0 }
 0xaae   : > { %v1653_v39 = vmul.f32 0.17677669, %v1646_v37  ;;  %3292 = vmatprep.subr.bf16.mxu0 %v3864_v0 }
 0xaaf   : > { %v3278_v15 = vpop.f32.mrf.mxu1 }
 0xab0   : > { %v1655_v61 = vsel %vm918_vm15, %v1653_v39, -inf }
 0xab1   : > { %1656 = vmax.xlane.f32.xlu0 %v1655_v61  ;;  %v1649_v29 = vpop.f32.mrf.mxu1 }
 0xab2   : > { %v1654_v40 = vmul.f32 0.17677669, %v1649_v29 }
 0xab3   : > { %v3279_v42 = vpop.f32.mrf.mxu1 }
 0xab4   : > { %v1658_v46 = vsel %vm918_vm15, %v1654_v40, -inf }
 0xab5   : > { %1659 = vmax.xlane.f32.xlu1 %v1658_v46  ;;  %v1769_v48 = vpop.f32.mrf.mxu1 }
 0xab6   : > { %v1776_v50 = vmul.f32 0.17677669, %v1769_v48 }
 0xab7   : > { %v3290_v51 = vpop.f32.mrf.mxu1 }
 0xab8   : > { %v1778_v52 = vsel %vm918_vm15, %v1776_v50, -inf }
 0xab9   : > { %1779 = vmax.xlane.f32.xlu0 %v1778_v52  ;;  %v1772_v54 = vpop.f32.mrf.mxu1 }
 0xaba   : > { %v1777_v55 = vmul.f32 0.17677669, %v1772_v54 }
 0xabb   : > { %v3291_v56 = vpop.f32.mrf.mxu1 }
 0xabc   : > { %v1781_v57 = vsel %vm918_vm15, %v1777_v55, -inf }
 0xabd   : > { %1782 = vmax.xlane.f32.xlu0 %v1781_v57 }
 0xb3a   : > { %v1657_v58 = vpop.xlane.xlu0 %1656 }
 0xb3b   : > { %v1661_v59 = vsub.f32 %v1653_v39, %v1657_v58 }
 0xb3d   : > { %v1663_v60 = vmul.f32 1.442695, %v1661_v59 }
 0xb3e   : > { %v1660_v62 = vpop.xlane.xlu1 %1659 }
 0xb3f   : > { %3626 = vpow2.f32 %v1663_v60  ;;  %v1662_v63 = vsub.f32 %v1654_v40, %v1660_v62 }
 0xb41   : > { %v1665_v1 = vmul.f32 1.442695, %v1662_v63 }
 0xb42   : > { %v1780_v2 = vpop.xlane.xlu0 %1779 }
 0xb43   : > { %3628 = vpow2.f32 %v1665_v1  ;;  %v1784_v4 = vsub.f32 %v1776_v50, %v1780_v2 }
 0xb45   : > { %v1786_v5 = vmul.f32 1.442695, %v1784_v4 }
 0xb46   : > { %v1783_v14 = vpop.xlane.xlu0 %1782 }
 0xb47   : > { %3630 = vpow2.f32 %v1786_v5  ;;  %v1785_v17 = vsub.f32 %v1777_v55, %v1783_v14 }
 0xb49   : > { %v1788_v13 = vmul.f32 1.442695, %v1785_v17 }
 0xb4b   : > { %3632 = vpow2.f32 %v1788_v13 }
 0xb4c   : > { %v3627_v41 = vpop.eup %3626 }
 0xb4d   : > { %v1667_v47 = vsel %vm918_vm15, %v3627_v41, 0.0 }
 0xb4e   : > { %1668 = vadd.xlane.f32.xlu1 %v1667_v47 }
 0xb50   : > { %v3629_v18 = vpop.eup %3628 }
 0xb51   : > { %v1670_v45 = vsel %vm918_vm15, %v3629_v18, 0.0 }
 0xb52   : > { %1671 = vadd.xlane.f32.xlu0 %v1670_v45 }
 0xb54   : > { %v3631_v49 = vpop.eup %3630 }
 0xb55   : > { %v1790_v20 = vsel %vm918_vm15, %v3631_v49, 0.0 }
 0xb56   : > { %1791 = vadd.xlane.f32.xlu1 %v1790_v20 }
 0xb58   : > { %v3633_v21 = vpop.eup %3632 }
 0xb59   : > { %v1793_v22 = vsel %vm918_vm15, %v3633_v21, 0.0 }
 0xb5a   : > { %1794 = vadd.xlane.f32.xlu0 %v1793_v22 }
 0xb67   : > { %1802 = vrot.lane.b32.xlu1 %v4370_v8, %s3873_s13 }
 0xb6b   : > { %1938 = vrot.lane.b32.xlu1 %v4211_v6, %s3874_s22 }
 0xb6c   : > { %v1597_v24 = vpop.f32.mrf.mxu0 }
 0xb6d   : > { %v4390_v27 = vadd.f32 %v1597_v24, %v4332_v3 }
 0xb6e   : > { %v3272_v28 = vpop.f32.mrf.mxu0 }
 0xb70   : > { %1940 = vrot.lane.b32.xlu0 %v4227_v19, %s3874_s22  ;;  %v1600_v53 = vpop.f32.mrf.mxu0 }
 0xb71   : > { %v4395_v33 = vadd.f32 %v1600_v53, %v4336_v16 }
 0xb72   : > { %v3273_v9 = vpop.f32.mrf.mxu0 }
 0xbd7   : > { %v1669_v7 = vpop.xlane.xlu1 %1668 }
 0xbd8   : > { %3634 = vrcp.f32 %v1669_v7 }
 0xbdb   : > { %v1672_v34 = vpop.xlane.xlu0 %1671 }
 0xbdc   : > { %3636 = vrcp.f32 %v1672_v34 }
 0xbdf   : > { %v1792_v35 = vpop.xlane.xlu1 %1791 }
 0xbe0   : > { %3638 = vrcp.f32 %v1792_v35 }
 0xbe3   : > { %v1795_v26 = vpop.xlane.xlu0 %1794  ;;  %v1803_v29 = vpop.permute.xlu1 %1802 }
 0xbe4   : > { %3640 = vrcp.f32 %v1795_v26 }
 0xbe5   : > { %v3635_v37 = vpop.eup %3634 }
 0xbe6   : > { %v1675_v39 = vmul.f32 %v3635_v37, %v3627_v41 }
 0xbe7   : > { %v1941_v57 = vpop.permute.xlu0 %1940  ;;  %v1939_v62 = vpop.permute.xlu1 %1938 }
 0xbe9   : > { %v3637_v3 = vpop.eup %3636 }
 0xbea   : > { %v1676_v15 = vmul.f32 %v3637_v3, %v3629_v18 }
 0xbec   : > { %v1677_v61 = vpack.c.bf16 %v1676_v15, %v1675_v39 }
 0xbed   : > { %v3639_v40 = vpop.eup %3638 }
 0xbee   : > { %3283 = vmatmul.mubr.msk.bf16.vlgmr.msra.gmra.mxu0 %vm918_vm15, %v1677_v61  ;;  %v1798_v42 = vmul.f32 %v3639_v40, %v3631_v49 }
 0xbef   : > { %3293 = vmatpush3.bf16.msra.mxu0 %v1803_v29  ;;  %3294 = vmatprep.mubr.msk.bf16.mxu0 %vm3870_vm0, %v3864_v0 }
 0xbf0   : > { %3306 = vmatprep.subr.bf16.mxu0 %v3864_v0 }
 0xbf1   : > { %v3641_v16 = vpop.eup %3640 }
 0xbf2   : > { %v1799_v46 = vmul.f32 %v3641_v16, %v3633_v21 }
 0xbf4   : > { %v1800_v48 = vpack.c.bf16 %v1799_v46, %v1798_v42 }
 0xbf6   : > { %3295 = vmatmul.mubr.msk.bf16.vlgmr.msra.gmra.mxu0 %vm918_vm15, %v1800_v48 }
 0xbf7   : > { %3307 = vmatpush3.bf16.msra.mxu0 %v4256_v23  ;;  %3310 = vmatprep.mubr.msk.bf16.mxu0 %vm3870_vm0, %v3864_v0 }
 0xbf8   : > { %3308 = vmatprep.subr.bf16.mxu0 %v3864_v0 }
 0xbfb   : > { %3309 = vmatpush3.bf16.msra.mxu0 %v4260_v25  ;;  %v1946_v25 = vsel %vm868_vm14, %v1941_v57, 0 }
 0xbfc   : > { %3320 = vmatprep.subr.bf16.mxu0 %v3864_v0 }
 0xcae   : > { %v1715_v50 = vpop.f32.mrf.mxu0 }
 0xcb0   : > { %v3284_v51 = vpop.f32.mrf.mxu0 }
 0xcb2   : > { %v1718_v52 = vpop.f32.mrf.mxu0 }
 0xcb3   : > { %v1722_v54 = vpack.c.bf16 %v1718_v52, %v1715_v50 }
 0xcb4   : > { %v3285_v55 = vpop.f32.mrf.mxu0 }
 0xcb5   : > { %3311 = vmatmul.mubr.msk.bf16.vlgmr.msra.gmra.mxu0 %vm868_vm14, %v1722_v54 }
 0xcb6   : > { %v1842_v56 = vpop.f32.mrf.mxu0  ;;  %3322 = vmatprep.mubr.msk.bf16.mxu0 %vm3870_vm0, %v3864_v0 }
 0xcb8   : > { %v3296_v23 = vpop.f32.mrf.mxu0 }
 0xcba   : > { %v1845_v58 = vpop.f32.mrf.mxu0 }
 0xcbb   : > { %v1849_v59 = vpack.c.bf16 %v1845_v58, %v1842_v56 }
 0xcbc   : > { %v3297_v60 = vpop.f32.mrf.mxu0 }
 0xcbd   : > { %3303 = vmatmul.mubr.msk.bf16.vlgmr.msra.gmra.mxu1 %vm868_vm14, %v1849_v59 }
 0xcbe   : > { %3315 = vmatpush3.bf16.xpose.msra.mxu1 %v1946_v25  ;;  %3316 = vmatprep.mubr.msk.bf16.mxu1 %vm3870_vm0, %v3864_v0 }
 0xcbf   : > { %3326 = vmatprep.subr.bf16.mxu1 %v3864_v0 }
 0xcc5   : > { %3317 = vmatmul.mubr.msk.bf16.vlgmr.msra.gmra.mxu1 %vm868_vm14, %v1939_v62 }
 0xcc6   : > { %3327 = vmatpush3.bf16.msra.mxu1 %v4309_v31  ;;  %3330 = vmatprep.mubr.msk.bf16.mxu1 %vm3870_vm0, %v3864_v0 }
 0xcc7   : > { %3328 = vmatprep.subr.bf16.mxu1 %v3864_v0 }
 0xcca   : > { %3329 = vmatpush3.bf16.msra.mxu1 %v4313_v32 }
 0xccb   : > { %3340 = vmatprep.subr.bf16.mxu1 %v3864_v0 }
 0xd75   : > { %v1931_v63 = vpop.f32.mrf.mxu0 }
 0xd77   : > { %v3312_v1 = vpop.f32.mrf.mxu0 }
 0xd79   : > { %v1934_v2 = vpop.f32.mrf.mxu0 }
 0xd7b   : > { %v3313_v4 = vpop.f32.mrf.mxu0 }
 0xd7d   : > { %v1887_v5 = vpop.f32.mrf.mxu1 }
 0xd7e   : > { %v4423_v14 = vadd.f32 %v1931_v63, %v1887_v5 }
 0xd7f   : > { %v3304_v17 = vpop.f32.mrf.mxu1 }
 0xd80   : > { %v2982_v17 = vld [vmem:[%s4593_s4 + $0x3] ss:$0 sm:$0xff] }
 0xd81   : > { %v1890_v13 = vpop.f32.mrf.mxu1 }
 0xd82   : > { %v4425_v41 = vadd.f32 %v1934_v2, %v1890_v13 }
 0xd83   : > { %v3305_v31 = vpop.f32.mrf.mxu1 }
 0xd85   : > { %v1982_v47 = vpop.f32.mrf.mxu1 }
 0xd86   : > { %v1989_v18 = vmul.f32 0.17677669, %v1982_v47 }
 0xd87   : > { %v3318_v45 = vpop.f32.mrf.mxu1 }
 0xd88   : > { %v1991_v49 = vsel %vm918_vm15, %v1989_v18, -inf }
 0xd89   : > { %1992 = vmax.xlane.f32.xlu1 %v1991_v49  ;;  %v1985_v32 = vpop.f32.mrf.mxu1 }
 0xd8a   : > { %v1990_v20 = vmul.f32 0.17677669, %v1985_v32 }
 0xd8b   : > { %v3319_v21 = vpop.f32.mrf.mxu1 }
 0xd8c   : > { %v1994_v22 = vsel %vm918_vm15, %v1990_v20, -inf }
 0xd8d   : > { %1995 = vmax.xlane.f32.xlu0 %v1994_v22 }
 0xe12   : > { %v1993_v24 = vpop.xlane.xlu1 %1992 }
 0xe13   : > { %v1997_v28 = vsub.f32 %v1989_v18, %v1993_v24  ;;  %v2284_v18 = vadd.f32 %v2982_v17, %v4395_v33 }
 0xe15   : > { %v1999_v53 = vmul.f32 1.442695, %v1997_v28  ;;  %v4468_v49 = vadd.f32 %v2284_v18, %v4177_v38 }
 0xe16   : > { %v1996_v9 = vpop.xlane.xlu0 %1995 }
 0xe17   : > { %3642 = vpow2.f32 %v1999_v53  ;;  %v1998_v7 = vsub.f32 %v1990_v20, %v1996_v9 }
 0xe19   : > { %v2001_v34 = vmul.f32 1.442695, %v1998_v7 }
 0xe1b   : > { %3644 = vpow2.f32 %v2001_v34 }
 0xe24   : > { %v3643_v35 = vpop.eup %3642 }
 0xe25   : > { %v2003_v26 = vsel %vm918_vm15, %v3643_v35, 0.0 }
 0xe26   : > { %2004 = vadd.xlane.f32.xlu0 %v2003_v26 }
 0xe28   : > { %v3645_v37 = vpop.eup %3644 }
 0xe29   : > { %v2006_v3 = vsel %vm918_vm15, %v3645_v37, 0.0 }
 0xe2a   : > { %2007 = vadd.xlane.f32.xlu1 %v2006_v3 }
 0xe3b   : > { %2110 = vrot.lane.b32.xlu1 %v4227_v19, %s3875_s16 }
 0xe3c   : > { %2014 = vrot.lane.b32.xlu0 %v4370_v8, %s3874_s22  ;;  %s2766_s22 = sshll.u32 %s368_s18, 4  ;;  %s4540_s22 = int_to_ptr.vmem [resolvable:$true] %s2766_s22 }
 0xe3d   : > { %s3780_s17 = scalar_lea.vmem %s4540_s22, 512 }
 0xe3e   : > { %p3781_p12 = scmp.ne.s32.totalorder %s4540_s22, %s3780_s17 }
 0xe3f   : > { %2108 = vrot.lane.b32.xlu1 %v4211_v6, %s3875_s16 }
 0xe40   : > { %p3782_p5 = pnand %p3781_p12, %p4633_p0 }
 0xe42   : > { %p3783_p10 = pneg %p3782_p5 }
 0xeaf   : > { %v2005_v39 = vpop.xlane.xlu0 %2004 }
 0xeb0   : > { %3646 = vrcp.f32 %v2005_v39 }
 0xeb3   : > { %v2008_v15 = vpop.xlane.xlu1 %2007  ;;  %v2015_v61 = vpop.permute.xlu0 %2014 }
 0xeb4   : > { %3648 = vrcp.f32 %v2008_v15  ;;  %3321 = vmatpush3.bf16.msra.mxu0 %v2015_v61 }
 0xeb5   : > { %3334 = vmatprep.subr.bf16.mxu0 %v3864_v0 }
 0xeb7   : > { %v2111_v46 = vpop.permute.xlu1 %2110 }
 0xeb8   : > { %v2116_v48 = vsel %vm868_vm14, %v2111_v46, 0 }
 0xebb   : > { %v2109_v6 = vpop.permute.xlu1 %2108 }
 0xebd   : > { %v3647_v29 = vpop.eup %3646 }
 0xebe   : > { %v2011_v16 = vmul.f32 %v3647_v29, %v3643_v35 }
 0xec1   : > { %v3649_v40 = vpop.eup %3648 }
 0xec2   : > { %v2012_v42 = vmul.f32 %v3649_v40, %v3645_v37 }
 0xec4   : > { %v2013_v19 = vpack.c.bf16 %v2012_v42, %v2011_v16 }
 0xec6   : > { %3323 = vmatmul.mubr.msk.bf16.vlgmr.msra.gmra.mxu0 %vm918_vm15, %v2013_v19 }
 0xec7   : > { %3335 = vmatpush3.bf16.xpose.msra.mxu0 %v2116_v48  ;;  %3336 = vmatprep.mubr.msk.bf16.mxu0 %vm3870_vm0, %v3864_v0 }
 0xec8   : > { %3346 = vmatprep.subr.bf16.mxu0 %v3864_v0 }
 0xece   : > { %3337 = vmatmul.mubr.msk.bf16.vlgmr.msra.gmra.mxu0 %vm868_vm14, %v2109_v6 }
 0xecf   : > { %3347 = vmatpush3.bf16.msra.mxu0 %v4338_v10  ;;  %3350 = vmatprep.mubr.msk.bf16.mxu0 %vm3870_vm0, %v3864_v0 }
 0xed0   : > { %3348 = vmatprep.subr.bf16.mxu0 %v3864_v0 }
 0xed3   : > { %3349 = vmatpush3.bf16.msra.mxu0 %v4362_v30 }
 0xf86   : > { %v2054_v50 = vpop.f32.mrf.mxu0 }
 0xf88   : > { %v3324_v51 = vpop.f32.mrf.mxu0 }
 0xf8a   : > { %v2057_v52 = vpop.f32.mrf.mxu0 }
 0xf8b   : > { %v2061_v54 = vpack.c.bf16 %v2057_v52, %v2054_v50 }
 0xf8c   : > { %v3325_v55 = vpop.f32.mrf.mxu0 }
 0xf8d   : > { %3331 = vmatmul.mubr.msk.bf16.vlgmr.msra.gmra.mxu1 %vm868_vm14, %v2061_v54 }
 0xf8e   : > { %v2152_v56 = vpop.f32.mrf.mxu0  ;;  %3342 = vmatprep.mubr.msk.bf16.mxu1 %vm3870_vm0, %v3864_v0 }
 0xf8f   : > { %v2159_v23 = vmul.f32 0.17677669, %v2152_v56  ;;  %v3556_v56 = vld [vmem:[#allocation7 + $0x74] ss:$8 sps:$4 sm:$0xff]  }
 0xf90   : > { %v3338_v10 = vpop.f32.mrf.mxu0 }
 0xf91   : > { %v2161_v57 = vsel %vm918_vm15, %v2159_v23, -inf  ;;  %v3557_v10 = vld [vmem:[#allocation7 + $0x60] ss:$8 sps:$4 sm:$0xff]  }
 0xf92   : > { %2162 = vmax.xlane.f32.xlu0 %v2161_v57  ;;  %v2155_v58 = vpop.f32.mrf.mxu0  ;;  %v3562_v57 = vld [vmem:[#allocation7 + $0x54] ss:$8 sps:$4 sm:$0xff]  }
 0xf93   : > { %v2160_v59 = vmul.f32 0.17677669, %v2155_v58  ;;  %v3560_v58 = vld [vmem:[#allocation7 + $0x50] ss:$8 sps:$4 sm:$0xff]  }
 0xf94   : > { %v3339_v60 = vpop.f32.mrf.mxu0 }
 0xf95   : > { %v2164_v30 = vsel %vm918_vm15, %v2160_v59, -inf  ;;  %v3568_v60 = vld [vmem:[#allocation7 + $0x34] ss:$8 sps:$4 sm:$0xff]  }
 0xf96   : > { %2165 = vmax.xlane.f32.xlu1 %v2164_v30  ;;  %v3566_v30 = vld [vmem:[#allocation7 + $0x30] ss:$8 sps:$4 sm:$0xff]  }
 0xfa7   : > { %2184 = vrot.lane.b32.xlu1 %v4370_v8, %s3875_s16  ;;  %v2283_v8 = vadd.f32 %v2982_v17, %v4390_v27  ;;  %s3027_s16 = sshll.u32 %s3945_s9, 9  ;;  %s3876_s9 = smov [#allocation10]  }
 0xfa8   : > { %s4545_s26 = scalar_lea.hbm %s4597_s8, %s3027_s16  ;;  %s3784_s10 = sshll.u32 %s3876_s9, 4  ;;  %s3785_s10 = int_to_ptr.vmem [resolvable:$false] %s3784_s10 }
 0xfa9   : > { %v4464_v45 = vadd.f32 %v2283_v8, %v4175_v36  ;;  %s3786_s11 = scalar_lea.vmem %s3785_s10, 1024  ;;  %p3787_p1 = scmp.lt.s32.totalorder %s4540_s22, %s3785_s10 }
 0xfaa   : > { %p3788_p2 = scmp.lt.s32.totalorder %s3786_s11, %s3780_s17 }
 0xfac   : > { %p3789_p3 = por %p3788_p2, %p3787_p1 }
 0xfae   : > { %p3790_p9 = pnand %p3789_p3, %p3783_p10 }
0x101b   : > { %v2163_v25 = vpop.xlane.xlu0 %2162 }
0x101c   : > { %v2167_v62 = vsub.f32 %v2159_v23, %v2163_v25  ;;  %v3554_v23 = vld [vmem:[#allocation7 + $0x70] ss:$8 sps:$4 sm:$0xff]   ;;  %v3571_v25 = vld [vmem:[#allocation7 + $0x24] ss:$8 sps:$4 sm:$0xff]  }
0x101e   : > { %v2169_v63 = vmul.f32 1.442695, %v2167_v62  ;;  %v3569_v62 = vld [vmem:[#allocation7 + $0x20] ss:$8 sps:$4 sm:$0xff]  }
0x101f   : > { %v2166_v1 = vpop.xlane.xlu1 %2165 }
0x1020   : > { %3650 = vpow2.f32 %v2169_v63  ;;  %v2168_v0 = vsub.f32 %v2160_v59, %v2166_v1  ;;  %v3563_v59 = vld [vmem:[#allocation7 + $0x40] ss:$8 sps:$4 sm:$0xff]   ;;  %v3574_v63 = vld [vmem:[#allocation7 + $0x14] ss:$8 sps:$4 sm:$0xff]   ;;  %v3572_v1 = vld [vmem:[#allocation7 + $0x10] ss:$8 sps:$4 sm:$0xff]  }
0x1022   : > { %v2171_v2 = vmul.f32 1.442695, %v2168_v0  ;;  %v3577_v0 = vld [vmem:[#allocation7 + $0x4] ss:$8 sps:$4 sm:$0xff]  }
0x1023   : > { %v2185_v4 = vpop.permute.xlu1 %2184 }
0x1024   : > { %3652 = vpow2.f32 %v2171_v2  ;;  %3341 = vmatpush3.bf16.msra.mxu1 %v2185_v4  ;;  %v3575_v2 = vld [vmem:[#allocation7] ss:$8 sps:$4 sm:$0xff]  }
0x1025   : > { %2496 = vmatprep.subr.bf16.mxu1 %v3556_v56  ;;  %v3583_v56 = vld [vmem:[#allocation8 + $0x28] sm:$0xff]  }
0x102d   : > { %v3651_v5 = vpop.eup %3650 }
0x102e   : > { %v2173_v13 = vsel %vm918_vm15, %v3651_v5, 0.0 }
0x102f   : > { %2174 = vadd.xlane.f32.xlu0 %v2173_v13 }
0x1031   : > { %v3653_v31 = vpop.eup %3652 }
0x1032   : > { %v2176_v47 = vsel %vm918_vm15, %v3653_v31, 0.0 }
0x1033   : > { %2177 = vadd.xlane.f32.xlu0 %v2176_v47 }
0x1037   : > { %2291 = vadd.xlane.f32.xlu0 %v4464_v45 }
0x103b   : > { %2293 = vadd.xlane.f32.xlu0 %v4468_v49 }
0x104d   : > { %v2099_v32 = vpop.f32.mrf.mxu1 }
0x104e   : > { %v2106_v20 = vadd.f32 %v2099_v32, %v4423_v14 }
0x104f   : > { %v3332_v21 = vpop.f32.mrf.mxu1 }
0x1051   : > { %v2102_v27 = vpop.f32.mrf.mxu1 }
0x1052   : > { %v2107_v22 = vadd.f32 %v2102_v27, %v4425_v41 }
0x1053   : > { %v3333_v24 = vpop.f32.mrf.mxu1 }
0x10b8   : > { %v2175_v28 = vpop.xlane.xlu0 %2174 }
0x10b9   : > { %3654 = vrcp.f32 %v2175_v28 }
0x10bc   : > { %v2178_v33 = vpop.xlane.xlu0 %2177 }
0x10bd   : > { %3656 = vrcp.f32 %v2178_v33 }
0x10c0   : > { %v2292_v36 = vpop.xlane.xlu0 %2291 }
0x10c1   : > { %v2300_v53 = vmul.f32 0.0078125, %v2292_v36 }
0x10c3   : > { %v4474_v9 = vsub.f32 %v4464_v45, %v2300_v53 }
0x10c4   : > { %v2294_v40 = vpop.xlane.xlu0 %2293 }
0x10c5   : > { %v2308_v38 = vmul.f32 %v4474_v9, %v4474_v9  ;;  %v2301_v19 = vmul.f32 0.0078125, %v2294_v40 }
0x10c6   : > { %v3655_v7 = vpop.eup %3654 }
0x10c7   : > { %2312 = vadd.xlane.f32.xlu1 %v2308_v38  ;;  %v2181_v34 = vmul.f32 %v3655_v7, %v3651_v5  ;;  %v4486_v52 = vsub.f32 %v4468_v49, %v2301_v19 }
0x10c9   : > { %v2309_v55 = vmul.f32 %v4486_v52, %v4486_v52 }
0x10ca   : > { %v3657_v14 = vpop.eup %3656 }
0x10cb   : > { %v2182_v35 = vmul.f32 %v3657_v14, %v3653_v31 }
0x10cd   : > { %v2183_v26 = vpack.c.bf16 %v2182_v35, %v2181_v34 }
0x10cf   : > { %3343 = vmatmul.mubr.msk.bf16.vlgmr.msra.gmra.mxu1 %vm918_vm15, %v2183_v26 }
0x10d0   : > { %2528 = vmatprep.mubr.bf16.mxu1 %v3872_v11  ;;  %2497 = vmatpush1.bf16.msra.mxu1 %v3554_v23  ;;  %v3584_v23 = vld [vmem:[#allocation8 + $0x60] sm:$0xff]  }
0x1150   : > { %v2313_v4 = vpop.xlane.xlu1 %2312 }
0x1151   : > { %v2320_v5 = vmul.f32 0.0078125, %v2313_v4 }
0x118f   : > { %v2224_v41 = vpop.f32.mrf.mxu1 }
0x1191   : > { %v3344_v37 = vpop.f32.mrf.mxu1 }
0x1193   : > { %v2227_v3 = vpop.f32.mrf.mxu1 }
0x1194   : > { %v2231_v39 = vpack.c.bf16 %v2227_v3, %v2224_v41  ;;  %v4507_v3 = vld [vmem:[%s4593_s4 + $0x4] ss:$0 sm:$0xff] }
0x1195   : > { %v3345_v15 = vpop.f32.mrf.mxu1 }
0x1196   : > { %3351 = vmatmul.mubr.msk.bf16.vlgmr.msra.gmra.mxu0 %vm868_vm14, %v2231_v39  ;;  %v2361_v15 = vmul.f32 %v4507_v3, %v4474_v9  ;;  %v3578_v9 = vld [vmem:[#allocation8 + $0x78] sm:$0xff]  }
0x1197   : > { %3110 = vmatprep.subr.bf16.mxu0 %v3578_v9 }
0x1256   : > { %v2269_v61 = vpop.f32.mrf.mxu0 }
0x1257   : > { %v2276_v29 = vadd.f32 %v2269_v61, %v2106_v20  ;;  %v2362_v61 = vmul.f32 %v4507_v3, %v4486_v52  ;;  %v3581_v52 = vld [vmem:[#allocation8 + $0x30] sm:$0xff]  }
0x1258   : > { %v3352_v16 = vpop.f32.mrf.mxu0 }
0x1259   : > { %v2285_v42 = vadd.f32 %v2982_v17, %v2276_v29  ;;  %v4516_v16 = vld [vmem:[%s4593_s4 + $0x5] ss:$0 sm:$0xff] }
0x125a   : > { %v2272_v46 = vpop.f32.mrf.mxu0 }
0x125b   : > { %v2277_v48 = vadd.f32 %v2272_v46, %v2107_v22  ;;  %v4482_v6 = vadd.f32 %v2285_v42, %v4181_v43  ;;  %v3559_v43 = vld [vmem:[#allocation7 + $0x64] ss:$8 sps:$4 sm:$0xff]  }
0x125c   : > { %v3353_v50 = vpop.f32.mrf.mxu0  ;;  %2498 = vmatprep.subr.bf16.mxu1 %v3559_v43  ;;  %v3585_v43 = vld [vmem:[#allocation8 + $0x20] sm:$0xff]  }
0x125d   : > { %v2286_v51 = vadd.f32 %v2982_v17, %v2277_v48  ;;  %2295 = vadd.xlane.f32.xlu0 %v4482_v6  ;;  %2499 = vmatpush1.bf16.msra.mxu1 %v3557_v10  ;;  %v2324_v17 = vmul.f32 1.007874, %v2320_v5  ;;  %v3579_v50 = vld [vmem:[#allocation8 + $0x38] sm:$0xff]  }
0x125e   : > { %2500 = vmatprep.subr.bf16.mxu1 %v3562_v57  ;;  %3111 = vmatpush3.bf16.msra.mxu0 %v3579_v50  ;;  %v3586_v10 = vld [vmem:[#allocation8 + $0x58] sm:$0xff]  }
0x125f   : > { %v4489_v54 = vadd.f32 %v2286_v51, %v4183_v44  ;;  %v3565_v44 = vld [vmem:[#allocation7 + $0x44] ss:$8 sps:$4 sm:$0xff]   ;;  %3658 = vrsqrt.f32 %v2324_v17  ;;  %vm2330_vm0 = vcmp.eq.f32.partialorder %v2324_v17, inf  ;;  %v2333_v53 = vand.u32 2147483648, %v2324_v17  ;;  %v3580_v51 = vld [vmem:[#allocation8 + $0x70] sm:$0xff]   ;;  %v3587_v57 = vld [vmem:[#allocation8 + $0x18] sm:$0xff]  }
0x1260   : > { %vm2332_vm1 = vcmp.eq.f32.partialorder %v2324_v17, 0.0  ;;  %3112 = vmatprep.subr.bf16.mxu0 %v3580_v51 }
0x1261   : > { %2297 = vadd.xlane.f32.xlu0 %v4489_v54  ;;  %2501 = vmatpush1.bf16.msra.mxu1 %v3560_v58  ;;  %v3589_v58 = vld [vmem:[#allocation8 + $0x10] sm:$0xff]  }
0x1262   : > { %2502 = vmatprep.subr.bf16.mxu1 %v3565_v44  ;;  %3113 = vmatpush3.bf16.msra.mxu0 %v3581_v52  ;;  %v3590_v44 = vld [vmem:[#allocation8 + $0x48] sm:$0xff]  }
0x1265   : > { %2314 = vadd.xlane.f32.xlu0 %v2309_v55  ;;  %2503 = vmatpush1.bf16.msra.mxu1 %v3563_v59  ;;  %v3582_v55 = vld [vmem:[#allocation8 + $0x68] sm:$0xff]  }
0x1266   : > { %2504 = vmatprep.subr.bf16.mxu1 %v3568_v60  ;;  %3114 = vmatprep.subr.bf16.mxu0 %v3582_v55  ;;  %v3591_v59 = vld [vmem:[#allocation8 + $0x8] sm:$0xff]   ;;  %v3592_v60 = vld [vmem:[#allocation8 + $0x40] sm:$0xff]  }
0x1267   : > { %3115 = vmatpush3.bf16.msra.mxu0 %v3583_v56 }
0x1268   : > { %3116 = vmatprep.subr.bf16.mxu0 %v3584_v23 }
0x1269   : > { %2505 = vmatpush1.bf16.msra.mxu1 %v3566_v30  ;;  %v3593_v30 = vld [vmem:[#allocation8] sm:$0xff]  }
0x126a   : > { %2506 = vmatprep.subr.bf16.mxu1 %v3571_v25 }
0x126b   : > { %3117 = vmatpush3.bf16.msra.mxu0 %v3585_v43 }
0x126c   : > { %v3659_v28 = vpop.eup %3658  ;;  %3118 = vmatprep.subr.bf16.mxu0 %v3586_v10 }
0x126d   : > { %2507 = vmatpush1.bf16.msra.mxu1 %v3569_v62  ;;  %v2329_v33 = vmul.f32 %v3659_v28, %v2324_v17 }
0x126e   : > { %2508 = vmatprep.subr.bf16.mxu1 %v3574_v63 }
0x126f   : > { %v2331_v36 = vsel %vm2330_vm0, %v2324_v17, %v2329_v33  ;;  %3119 = vmatpush3.bf16.msra.mxu0 %v3587_v57 }
0x1270   : > { %v2334_v38 = vsel %vm2332_vm1, %v2333_v53, %v2331_v36 }
0x1271   : > { %2509 = vmatpush1.bf16.msra.mxu1 %v3572_v1  ;;  %v2365_v7 = vadd.f32 1e-06, %v2334_v38 }
0x1272   : > { %2510 = vmatprep.subr.bf16.mxu1 %v3577_v0 }
0x1275   : > { %2511 = vmatpush1.bf16.msra.mxu1 %v3575_v2 }
0x12e6   : > { %v2296_v13 = vpop.xlane.xlu0 %2295 }
0x12e7   : > { %v2302_v31 = vmul.f32 0.0078125, %v2296_v13 }
0x12e9   : > { %v4495_v8 = vsub.f32 %v4482_v6, %v2302_v31 }
0x12ea   : > { %v2298_v47 = vpop.xlane.xlu0 %2297 }
0x12eb   : > { %v2303_v18 = vmul.f32 0.0078125, %v2298_v47  ;;  %v2310_v32 = vmul.f32 %v4495_v8, %v4495_v8  ;;  %v2363_v33 = vmul.f32 %v4507_v3, %v4495_v8  ;;  %v2404_v8 = vld [vmem:[%s4595_s6] sm:$0x3] }
0x12ed   : > { %v4500_v20 = vsub.f32 %v4489_v54, %v2303_v18  ;;  %2316 = vadd.xlane.f32.xlu0 %v2310_v32 }
0x12ee   : > { %v2315_v21 = vpop.xlane.xlu0 %2314 }
0x12ef   : > { %v2321_v27 = vmul.f32 0.0078125, %v2315_v21  ;;  %v2311_v22 = vmul.f32 %v4500_v20, %v4500_v20  ;;  %v2364_v36 = vmul.f32 %v4507_v3, %v4500_v20 }
0x12f1   : > { %v2325_v24 = vmul.f32 1.007874, %v2321_v27  ;;  %2318 = vadd.xlane.f32.xlu0 %v2311_v22 }
0x12f3   : > { %3660 = vrsqrt.f32 %v2325_v24  ;;  %vm2337_vm2 = vcmp.eq.f32.partialorder %v2325_v24, inf  ;;  %v2340_v35 = vand.u32 2147483648, %v2325_v24  ;;  %vm2339_vm3 = vcmp.eq.f32.partialorder %v2325_v24, 0.0 }
0x12f4   : > { %3662 = vrcp.f32 %v2365_v7 }
0x1300   : > { %v3661_v14 = vpop.eup %3660 }
0x1301   : > { %v2336_v34 = vmul.f32 %v3661_v14, %v2325_v24  ;;  %v3663_v39 = vpop.eup %3662 }
0x1302   : > { %v2373_v29 = vmul.f32 %v3663_v39, %v2361_v15 }
0x1303   : > { %v2338_v26 = vsel %vm2337_vm2, %v2325_v24, %v2336_v34 }
0x1304   : > { %v2341_v41 = vsel %vm2339_vm3, %v2340_v35, %v2338_v26  ;;  %v2382_v46 = vadd.f32 %v4516_v16, %v2373_v29  ;;  %v2407_v26 = vshrl.u32 %v378_v12, 7 }
0x1305   : > { %v2366_v37 = vadd.f32 1e-06, %v2341_v41 }
0x1306   : > { %v2412_v41 = vsub.s32 1, %v2407_v26 }
0x1307   : > { %3664 = vrcp.f32 %v2366_v37  ;;  %v2408_v37 = vsub.s32 0, %v2407_v26 }
0x1308   : > { %v2413_v15 = vrot.slane %v2404_v8, %v2412_v41 }
0x1309   : > { %v2409_v20 = vrot.slane %v2404_v8, %v2408_v37 }
0x1314   : > { %v3665_v40 = vpop.eup %3664 }
0x1315   : > { %v2374_v42 = vmul.f32 %v3665_v40, %v2362_v61 }
0x1317   : > { %v2383_v19 = vadd.f32 %v4516_v16, %v2374_v42 }
0x1319   : > { %v2386_v48 = vpack.c.bf16 %v2383_v19, %v2382_v46 }
0x131b   : > { %2529 = vmatmul.mubr.bf16.vlgmr.msra.gmra.mxu1 %v2386_v48 }
0x131c   : > { %2538 = vmatprep.mubr.bf16.mxu1 %v3872_v11  ;;  %v3588_v11 = vld [vmem:[#allocation8 + $0x50] sm:$0xff]  }
0x131d   : > { %3120 = vmatprep.subr.bf16.mxu0 %v3588_v11 }
0x131e   : > { %3121 = vmatpush3.bf16.msra.mxu0 %v3589_v58 }
0x131f   : > { %3122 = vmatprep.subr.bf16.mxu0 %v3590_v44 }
0x1322   : > { %3123 = vmatpush3.bf16.msra.mxu0 %v3591_v59 }
0x1323   : > { %3124 = vmatprep.subr.bf16.mxu0 %v3592_v60 }
0x1326   : > { %3125 = vmatpush3.bf16.msra.mxu0 %v3593_v30 }
0x1376   : > { %v2317_v25 = vpop.xlane.xlu0 %2316 }
0x1377   : > { %v2322_v62 = vmul.f32 0.0078125, %v2317_v25 }
0x1379   : > { %v2326_v63 = vmul.f32 1.007874, %v2322_v62 }
0x137a   : > { %v2319_v1 = vpop.xlane.xlu0 %2318 }
0x137b   : > { %3666 = vrsqrt.f32 %v2326_v63  ;;  %v2323_v0 = vmul.f32 0.0078125, %v2319_v1  ;;  %vm2344_vm4 = vcmp.eq.f32.partialorder %v2326_v63, inf  ;;  %v2347_v17 = vand.u32 2147483648, %v2326_v63 }
0x137c   : > { %vm2346_vm5 = vcmp.eq.f32.partialorder %v2326_v63, 0.0 }
0x137d   : > { %v2327_v2 = vmul.f32 1.007874, %v2323_v0 }
0x137f   : > { %3668 = vrsqrt.f32 %v2327_v2  ;;  %vm2351_vm6 = vcmp.eq.f32.partialorder %v2327_v2, inf  ;;  %v2354_v21 = vand.u32 2147483648, %v2327_v2  ;;  %vm2353_vm7 = vcmp.eq.f32.partialorder %v2327_v2, 0.0 }
0x1388   : > { %v3667_v4 = vpop.eup %3666 }
0x1389   : > { %v2343_v5 = vmul.f32 %v3667_v4, %v2326_v63 }
0x138b   : > { %v2345_v13 = vsel %vm2344_vm4, %v2326_v63, %v2343_v5  ;;  %v3001_v63 = vld [vmem:[%s4593_s4 + $0x6] ss:$0 sm:$0xff] }
0x138c   : > { %v2348_v31 = vsel %vm2346_vm5, %v2347_v17, %v2345_v13  ;;  %v3669_v47 = vpop.eup %3668 }
0x138d   : > { %v2367_v18 = vadd.f32 1e-06, %v2348_v31  ;;  %v2350_v32 = vmul.f32 %v3669_v47, %v2327_v2 }
0x138f   : > { %v2352_v27 = vsel %vm2351_vm6, %v2327_v2, %v2350_v32  ;;  %3670 = vrcp.f32 %v2367_v18 }
0x1390   : > { %v2355_v22 = vsel %vm2353_vm7, %v2354_v21, %v2352_v27 }
0x1391   : > { %v2368_v24 = vadd.f32 1e-06, %v2355_v22 }
0x1393   : > { %3672 = vrcp.f32 %v2368_v24 }
0x139c   : > { %v3671_v28 = vpop.eup %3670 }
0x139d   : > { %v2375_v53 = vmul.f32 %v3671_v28, %v2363_v33 }
0x139f   : > { %v2384_v14 = vadd.f32 %v4516_v16, %v2375_v53 }
0x13a0   : > { %v3673_v38 = vpop.eup %3672 }
0x13a1   : > { %v2376_v7 = vmul.f32 %v3673_v38, %v2364_v36 }
0x13a3   : > { %v2385_v34 = vadd.f32 %v4516_v16, %v2376_v7 }
0x13a5   : > { %v2387_v35 = vpack.c.bf16 %v2385_v34, %v2384_v14 }
0x13a7   : > { %2539 = vmatmul.mubr.bf16.gmra.mxu1 %v2387_v35 }
0x13db   : > { %v2530_v39 = vpop.f32.mrf.mxu1 }
0x13dc   : > { %v2531_v42 = vadd.f32 %v2530_v39, %v2409_v20 }
0x13dd   : > { %v2532_v3 = vpop.f32.mrf.mxu1 }
0x13de   : > { %v2533_v29 = vadd.f32 %v2532_v3, %v2413_v15  ;;  %v2549_v12 = vmax.f32 %v2531_v42, 0.0 }
0x13df   : > { %v2534_v61 = vpop.f32.mrf.mxu1 }
0x13e0   : > { %v2535_v40 = vadd.f32 %v2534_v61, %v2409_v20  ;;  %v2550_v48 = vmax.f32 %v2533_v29, 0.0 }
0x13e1   : > { %v2536_v46 = vpop.f32.mrf.mxu1 }
0x13e2   : > { %v2537_v16 = vadd.f32 %v2536_v46, %v2413_v15  ;;  %v2551_v19 = vmax.f32 %v2535_v40, 0.0 }
0x13e4   : > { %v2552_v9 = vmax.f32 %v2537_v16, 0.0  ;;  %v2557_v51 = vpack.c.bf16 %v2551_v19, %v2549_v12 }
0x13e6   : > { %v2558_v50 = vpack.c.bf16 %v2552_v9, %v2550_v48 }
0x13e8   : > { %2726 = vmatprep.mubr.bf16.mxu0 %v2558_v50 }
0x13e9   : > { %2727 = vmatmul.mubr.bf16.vlgmr.msra.gmra.mxu0 %v2557_v51 }
0x1467   : > { %v2540_v52 = vpop.f32.mrf.mxu1 }
0x1468   : > { %v2541_v10 = vadd.f32 %v2540_v52, %v2409_v20 }
0x1469   : > { %v2542_v55 = vpop.f32.mrf.mxu1 }
0x146a   : > { %v2543_v23 = vadd.f32 %v2542_v55, %v2413_v15  ;;  %v2553_v60 = vmax.f32 %v2541_v10, 0.0 }
0x146b   : > { %v2544_v56 = vpop.f32.mrf.mxu1 }
0x146c   : > { %v2545_v43 = vadd.f32 %v2544_v56, %v2409_v20  ;;  %v2554_v44 = vmax.f32 %v2543_v23, 0.0 }
0x146d   : > { %v2546_v57 = vpop.f32.mrf.mxu1 }
0x146e   : > { %v2547_v11 = vadd.f32 %v2546_v57, %v2413_v15  ;;  %v2555_v58 = vmax.f32 %v2545_v43, 0.0 }
0x1470   : > { %v2556_v59 = vmax.f32 %v2547_v11, 0.0  ;;  %v2559_v25 = vpack.c.bf16 %v2555_v58, %v2553_v60 }
0x1472   : > { %v2560_v30 = vpack.c.bf16 %v2556_v59, %v2554_v44 }
0x1474   : > { %2734 = vmatprep.mubr.bf16.mxu0 %v2560_v30 }
0x1475   : > { %2735 = vmatmul.mubr.bf16.gmra.mxu0 %v2559_v25 }
0x14a9   : > { %v3126_v62 = vpop.f32.mrf.mxu0 }
0x14ab   : > { %v3127_v1 = vpop.f32.mrf.mxu0 }
0x14ac   : > { %v3128_v0 = vadd.f32 %v3127_v1, %v3126_v62 }
0x14ad   : > { %v3129_v2 = vpop.f32.mrf.mxu0 }
0x14ae   : > { %v2729_v4 = vadd.f32 %v3128_v0, %v3001_v63 }
0x14af   : > { %v3130_v5 = vpop.f32.mrf.mxu0 }
0x14b0   : > { %v2743_v17 = vadd.f32 %v2729_v4, %v4464_v45  ;;  %v3131_v13 = vadd.f32 %v3130_v5, %v3129_v2 }
0x14b2   : > { %2747 = vst [vmem:[%s368_s18] sm:$0xff] %v2743_v17  ;;  %v2732_v31 = vadd.f32 %v3131_v13, %v3001_v63 }
0x14b4   : > { %v2744_v47 = vadd.f32 %v2732_v31, %v4468_v49 }
0x14b6   : > { %2748 = vst [vmem:[%s368_s18 + $0x8] sm:$0xff] %v2744_v47 }
0x1535   : > { %v3132_v18 = vpop.f32.mrf.mxu0 }
0x1537   : > { %v3133_v32 = vpop.f32.mrf.mxu0 }
0x1538   : > { %v3134_v21 = vadd.f32 %v3133_v32, %v3132_v18 }
0x1539   : > { %v3135_v27 = vpop.f32.mrf.mxu0 }
0x153a   : > { %v2737_v22 = vadd.f32 %v3134_v21, %v3001_v63 }
0x153b   : > { %v3136_v24 = vpop.f32.mrf.mxu0 }
0x153c   : > { %v2745_v45 = vadd.f32 %v2737_v22, %v4482_v6  ;;  %v3137_v28 = vadd.f32 %v3136_v24, %v3135_v27 }
0x153e   : > { %2749 = vst [vmem:[%s368_s18 + $0x10] sm:$0xff] %v2745_v45  ;;  %v2740_v49 = vadd.f32 %v3137_v28, %v3001_v63 }
0x1540   : > { %v2746_v33 = vadd.f32 %v2740_v49, %v4489_v54 }
0x1542   : > { %2750 = vst [vmem:[%s368_s18 + $0x18] sm:$0xff] %v2746_v33 }
0x1543   : > { %3793 = shalt.err (!%p3790_p9)
}
0x1544   : > { %s3794_s13 = scalar_lea.hbm %s4545_s26, 512  ;;  %s3798_s24 = scalar_lea.hbm %s4597_s8, 1024 }
0x1545   : > { %p3795_p7 = scmp.ne.s32.totalorder %s4545_s26, %s3794_s13  ;;  %p3799_p6 = scmp.lt.s32.totalorder %s4545_s26, %s4597_s8 }
0x1546   : > { %p3800_p11 = scmp.lt.s32.totalorder %s3798_s24, %s3794_s13 }
0x1547   : > { %p3796_p4 = pnand %p3795_p7, %p4633_p0 }
0x1548   : > { %p3801_p13 = por %p3800_p11, %p3799_p6 }
0x1549   : > { %p3797_p8 = pneg %p3796_p4 }
0x154b   : > { %p3802_p12 = pnand %p3801_p13, %p3797_p8 }
0x154d   : > { %3805 = shalt.err (!%p3802_p12)
}
0x154e   : > { %s3877_s5 = smov 128   ;;  %s3878_s19 = smov 8  }
0x154f   : > { %3368 = dma.vmem_to_hbm [thread:$0]  (%p4633_p0), %s4540_s22, 512, %s4545_s26, %s2752_s20, %s3877_s5, %s3877_s5, %s3878_s19  }
0x1550 PF: > { %s2781_s17 = sand.u32 1, %s3840_s27   ;;  %p4634_p5 = scmp.ne.s32.totalorder %s4607_s12, 0 }
0x1551   : > { %p4635_p10 = scmp.ge.s32.totalorder %s3852_s30, 2  ;;  %s2782_s9 = scalar_lea.sflag [#allocation4], %s2781_s17 }
0x1553   : > { %p3385_p1 = pnand %p4635_p10, %p4634_p5 }
0x1555   : > { %p3386_p2 = pneg %p3385_p1 }
0x1557   : > { %3835 = dma.done.wait (%p3386_p2), %s2782_s9, 512  }
0x1558   : > { %3837 = vsyncadd (%p3386_p2), %s2782_s9, 4294966784  ;;  %p23_p3 = scmp.ge.s32.totalorder %s4007_s23, 4   ;;  %s4636_s27 = smov %s3844_s28 }
0x1559   : > { %s4637_s28 = smov %s3848_s29  ;;  %s4638_s29 = smov %s4017_s14 }
0x155a   : > { %s4639_s30 = smov %s4007_s23  ;;  %25 = sbr.rel (!%p23_p3) target bundleno = 10 (0xa), region = 109 }
0x155f   :  { %2787 = vsyncpa [#allocation3], 1 }
0x1560   :  { %2789 = vsyncpa [#allocation3 + $0x1], 1 }
0x1561   :  { %2790 = vsyncpa [#allocation6], 1 }
0x1562   :  { %2791 = vsyncpa [#allocation9], 1 }
0x1563   :  { %2792 = vsyncpa [#allocation4], 1 }
0x1564   :  { %2794 = vsyncpa [#allocation4 + $0x1], 1 }

</bundles_post_ra>
